<compile_context>
chip_gen: v6e
topology: v6e:2x2x1
jax: 0.10.0
libtpu: 0.0.40
codegen_flags: <defaults>
</compile_context>

<pallas_src>
import jax
import jax.numpy as jnp
from jax.experimental import pallas as pl
from jax.experimental.pallas import tpu as pltpu

EPS_AGG = 1e-6   # DGL aggregation epsilon
EPS_BN = 1e-5    # nn.BatchNorm1d default eps


def gated_gcn_kernel(src_ref, dst_ref, dstr_ref, h_ref, ah_ref, nl_ref, e_ref,
                     wc_ref, bc_ref, bnh_ref, bne_ref,
                     h_out_ref, e_out_ref,
                     acc_ref, lane_iota_ref, sub_iota_ref):
    i = pl.program_id(0)
    last = pl.num_programs(0) - 1
    N, D = h_ref.shape                      # padded N, padded D (multiple of 128)
    TE = e_ref.shape[0]

    # ---- one-time init: zero the scatter accumulator, build iota tables once.
    @pl.when(i == 0)
    def _():
        acc_ref[...] = jnp.zeros_like(acc_ref)
        lane_iota_ref[...] = jax.lax.broadcasted_iota(jnp.int32, (TE, N), 1)
        sub_iota_ref[...] = jax.lax.broadcasted_iota(jnp.int32, (N, TE), 0)

    # ---- current edge tile.
    src_c = src_ref[...]                    # [TE, 1] int32 (padded edges = -1)
    dst_c = dst_ref[...]                    # [TE, 1] int32
    dst_r = dstr_ref[...]                   # [1, TE] int32 (row layout, scatter)
    e_tile = e_ref[...]                     # [TE, D] f32

    # One-hot selection matrices, built in-register (exact 0/1 in bf16).
    oh_src = (lane_iota_ref[...] == src_c).astype(jnp.bfloat16)     # [TE, N]
    oh_dst = (lane_iota_ref[...] == dst_c).astype(jnp.bfloat16)     # [TE, N]
    oh_dst_t = (sub_iota_ref[...] == dst_r).astype(jnp.bfloat16)    # [N, TE]

    # Edge linear C(e) — bf16 MXU operands, f32 accumulation.
    ce = jnp.dot(e_tile.astype(jnp.bfloat16), wc_ref[...],
                 preferred_element_type=jnp.float32) + bc_ref[...]

    # Fused gather of [Dh | Bh] at src, and Eh at dst (bf16 MXU, f32 out).
    dhbh_src = jnp.dot(oh_src, nl_ref[:, :2 * D],
                       preferred_element_type=jnp.float32)          # [TE, 2D]
    eh_dst = jnp.dot(oh_dst, nl_ref[:, 2 * D:],
                     preferred_element_type=jnp.float32)            # [TE, D]
    dh_src = dhbh_src[:, :D]
    bh_src = dhbh_src[:, D:]

    # e_ij = Dh[src] + Eh[dst] + Ce ; sigma = sigmoid(e_ij)  (EUP logistic)
    e_new = dh_src + eh_dst + ce
    sigma = jax.nn.sigmoid(e_new)

    # Fused scatter-add of [Bh_src*sigma | sigma] over dst into [N, 2D] f32 acc.
    payload = jnp.concatenate([bh_src * sigma, sigma],
                              axis=1).astype(jnp.bfloat16)          # [TE, 2D]
    acc_ref[...] = acc_ref[...] + jnp.dot(oh_dst_t, payload,
                                          preferred_element_type=jnp.float32)

    # Edge output: folded eval-mode BatchNorm (scale/shift) + ReLU + residual.
    e_bn = e_new * bne_ref[0:1, :] + bne_ref[1:2, :]
    e_out_ref[...] = e_tile + jnp.maximum(e_bn, 0.0)

    # ---- finalize node output on the last edge tile.
    @pl.when(i == last)
    def _():
        sum_sigma_h = acc_ref[:, :D]
        sum_sigma = acc_ref[:, D:]
        denom = sum_sigma + EPS_AGG
        inv = pl.reciprocal(denom, approx=True)
        inv = inv * (2.0 - denom * inv)       # one Newton step -> ~f32 exact
        h_new = ah_ref[...] + sum_sigma_h * inv
        h_bn = h_new * bnh_ref[0:1, :] + bnh_ref[1:2, :]
        h_out_ref[...] = h_ref[...] + jnp.maximum(h_bn, 0.0)


def _round_up(x, m):
    return ((x + m - 1) // m) * m


def _vmem_limit_bytes():
    """Generation-aware scoped-VMEM budget (≤~110 MiB, cap-16 MiB on v7x)."""
    try:
        cap = int(pltpu.get_tpu_info().vmem_capacity_bytes)
    except Exception:
        cap = 64 * 1024 * 1024
    return max(32 * 1024 * 1024, min(cap - 16 * 1024 * 1024, 110 * 1024 * 1024))


def gated_gcn_layer(h, e, src, dst, W, b, bn_h, bn_e, *, edge_tile=256):
    """h: [N, D], e: [E, D], src/dst: [E] int32, W: [5, D, D] (transposed
    nn.Linear weights, order A,B,C,D,E), b: [5, D], bn_h/bn_e: [4, D]
    (gamma, beta, running_mean, running_var)."""
    N, D = h.shape
    E = e.shape[0]
    TE = edge_tile
    assert TE % 8 == 0, "edge tile must be a multiple of 8 (sublane); 128/256 preferred"

    D_pad = _round_up(D, 128)      # 128-lane aligned feature dim
    N_pad = _round_up(N, 8)        # sublane-aligned node count
    n_tiles = (E + TE - 1) // TE
    E_pad = n_tiles * TE
    dpad = D_pad - D

    # ---- pad node/edge features; padded edges use index -1 (all-zero one-hots).
    h_p = jnp.pad(h, ((0, N_pad - N), (0, dpad)))
    e_p = jnp.pad(e, ((0, E_pad - E), (0, dpad)))
    src_p = jnp.pad(src.astype(jnp.int32), (0, E_pad - E), constant_values=-1)
    dst_p = jnp.pad(dst.astype(jnp.int32), (0, E_pad - E), constant_values=-1)
    src_col = src_p.reshape(E_pad, 1)
    dst_col = dst_p.reshape(E_pad, 1)
    dst_row = dst_p.reshape(n_tiles, 1, TE)      # row layout for the scatter one-hot

    # ---- pad weights (zero pad rows/cols, zero bias -> padded channels stay 0).
    W_p = jnp.pad(W, ((0, 0), (0, dpad), (0, dpad)))
    b_p = jnp.pad(b, ((0, 0), (0, dpad)))

    # Fused node linear [Ah | Dh | Bh | Eh] computed by XLA (overlaps with the
    # kernel's initial DMAs); Ah stays f32, [Dh|Bh|Eh] goes bf16 for the MXU.
    W_node = jnp.concatenate([W_p[0], W_p[3], W_p[1], W_p[4]], axis=1)   # [D,4D]
    b_node = jnp.concatenate([b_p[0], b_p[3], b_p[1], b_p[4]], axis=0)
    node_all = h_p @ W_node + b_node                                     # [N,4D] f32
    ah = node_all[:, :D_pad]                                             # f32
    nl = node_all[:, D_pad:].astype(jnp.bfloat16)                        # [Dh|Bh|Eh]

    W_c = W_p[2].astype(jnp.bfloat16)
    b_c = b_p[2].reshape(1, D_pad)

    # Fold eval-mode BatchNorm into a single scale/shift (padded channels = identity).
    def fold_bn(p):
        gamma = jnp.pad(p[0], (0, dpad), constant_values=1.0)
        beta = jnp.pad(p[1], (0, dpad))
        mean = jnp.pad(p[2], (0, dpad))
        var = jnp.pad(p[3], (0, dpad), constant_values=1.0)
        scale = gamma * jax.lax.rsqrt(var + EPS_BN)
        shift = beta - mean * scale
        return jnp.stack([scale, shift]).astype(jnp.float32)             # [2, D_pad]

    bnh = fold_bn(bn_h)
    bne = fold_bn(bn_e)

    grid_spec = pltpu.PrefetchScalarGridSpec(
        num_scalar_prefetch=0,
        grid=(n_tiles,),
        in_specs=[
            pl.BlockSpec((TE, 1), lambda i: (i, 0)),            # src (col layout)
            pl.BlockSpec((TE, 1), lambda i: (i, 0)),            # dst (col layout)
            pl.BlockSpec((None, 1, TE), lambda i: (i, 0, 0)),   # dst (row layout)
            pl.BlockSpec((N_pad, D_pad), lambda i: (0, 0)),     # h (resident)
            pl.BlockSpec((N_pad, D_pad), lambda i: (0, 0)),     # Ah f32 (resident)
            pl.BlockSpec((N_pad, 3 * D_pad), lambda i: (0, 0)), # [Dh|Bh|Eh] bf16
            pl.BlockSpec((TE, D_pad), lambda i: (i, 0)),        # e tile (pipelined)
            pl.BlockSpec((D_pad, D_pad), lambda i: (0, 0)),     # W_c bf16
            pl.BlockSpec((1, D_pad), lambda i: (0, 0)),         # b_c
            pl.BlockSpec((2, D_pad), lambda i: (0, 0)),         # bn_h scale/shift
            pl.BlockSpec((2, D_pad), lambda i: (0, 0)),         # bn_e scale/shift
        ],
        out_specs=(
            pl.BlockSpec((N_pad, D_pad), lambda i: (0, 0)),     # h_out (resident)
            pl.BlockSpec((TE, D_pad), lambda i: (i, 0)),        # e_out tile
        ),
        scratch_shapes=[
            pltpu.VMEM((N_pad, 2 * D_pad), jnp.float32),        # scatter accumulator
            pltpu.VMEM((TE, N_pad), jnp.int32),                 # lane iota (hoisted)
            pltpu.VMEM((N_pad, TE), jnp.int32),                 # sublane iota (hoisted)
        ],
    )

    flops = 2 * (E_pad * D_pad * D_pad            # edge linear Ce
                 + E_pad * N_pad * 3 * D_pad      # gathers
                 + E_pad * N_pad * 2 * D_pad)     # scatter
    bytes_accessed = (4 * (3 * N_pad * D_pad + 2 * E_pad * D_pad + 6 * D_pad + 3 * E_pad)
                      + 2 * (3 * N_pad * D_pad + D_pad * D_pad))

    h_out, e_out_pad = pl.pallas_call(
        gated_gcn_kernel,
        grid_spec=grid_spec,
        out_shape=(jax.ShapeDtypeStruct((N_pad, D_pad), jnp.float32),
                   jax.ShapeDtypeStruct((E_pad, D_pad), jnp.float32)),
        compiler_params=pltpu.CompilerParams(
            dimension_semantics=("arbitrary",),                 # accumulation axis
            vmem_limit_bytes=_vmem_limit_bytes()),
        cost_estimate=pl.CostEstimate(flops=flops,
                                      transcendentals=E_pad * D_pad,
                                      bytes_accessed=bytes_accessed),
    )(src_col, dst_col, dst_row, h_p, ah, nl, e_p, W_c, b_c, bnh, bne)

    return h_out[:N, :D], e_out_pad[:E, :D]


def reference(h, e, src, dst, W, b, bn_h, bn_e):
    """Pure-JAX reference of the PyTorch forward (eval mode, residual=True)."""
    Ah = h @ W[0] + b[0]
    Bh = h @ W[1] + b[1]
    Ce = e @ W[2] + b[2]
    Dh = h @ W[3] + b[3]
    Eh = h @ W[4] + b[4]
    e_new = Dh[src] + Eh[dst] + Ce
    sigma = jax.nn.sigmoid(e_new)
    sum_sigma_h = jnp.zeros_like(Ah).at[dst].add(Bh[src] * sigma)
    sum_sigma = jnp.zeros_like(Ah).at[dst].add(sigma)
    h_new = Ah + sum_sigma_h / (sum_sigma + EPS_AGG)

    def bn(x, p):
        return (x - p[2]) / jnp.sqrt(p[3] + EPS_BN) * p[0] + p[1]

    h_new = jnp.maximum(bn(h_new, bn_h), 0.0)
    e_new = jnp.maximum(bn(e_new, bn_e), 0.0)
    return h + h_new, e + e_new


if __name__ == "__main__":
    N, E, D = 64, 300, 128   # nodes, edges, input_dim == output_dim
    key = jax.random.PRNGKey(0)
    k_h, k_e, k_w, k_b, k_g, k_bt, k_s, k_d = jax.random.split(key, 8)

    h = jax.random.normal(k_h, (N, D), dtype=jnp.float32)
    e = jax.random.normal(k_e, (E, D), dtype=jnp.float32)

    # deterministic synthetic connectivity
    src = jax.random.randint(k_s, (E,), 0, N, dtype=jnp.int32)
    dst = jax.random.randint(k_d, (E,), 0, N, dtype=jnp.int32)

    # nn.Linear-style init, U(-1/sqrt(in), 1/sqrt(in)); stored as W^T [in, out]
    bound = 1.0 / jnp.sqrt(jnp.float32(D))
    W = jax.random.uniform(k_w, (5, D, D), jnp.float32, -bound, bound)
    b = jax.random.uniform(k_b, (5, D), jnp.float32, -bound, bound)

    # BatchNorm1d params (gamma, beta, running_mean, running_var)
    gamma_h = 1.0 + 0.1 * jax.random.normal(k_g, (D,), jnp.float32)
    beta_h = 0.1 * jax.random.normal(k_bt, (D,), jnp.float32)
    bn_h = jnp.stack([gamma_h, beta_h, jnp.zeros((D,)), jnp.ones((D,))]).astype(jnp.float32)
    bn_e = jnp.stack([jnp.ones((D,)), jnp.zeros((D,)), jnp.zeros((D,)), jnp.ones((D,))]).astype(jnp.float32)

    h_out, e_out = gated_gcn_layer(h, e, src, dst, W, b, bn_h, bn_e, edge_tile=256)
    jax.block_until_ready((h_out, e_out))

    h_ref, e_ref = reference(h, e, src, dst, W, b, bn_h, bn_e)
    # bf16 MXU operands (f32 accumulation) -> loosened tolerance vs f32 reference.
    assert jnp.allclose(h_out, h_ref, atol=2e-2, rtol=2e-2), "h mismatch"
    assert jnp.allclose(e_out, e_ref, atol=2e-2, rtol=2e-2), "e mismatch"

    print("KERNEL_OK")
</pallas_src>

<mosaic_0001>
module attributes {stable_mosaic.version = 11 : i64} {
  func.func @gated_gcn_kernel(%arg0: i32, %arg1: memref<256x1xi32, #tpu.memory_space<vmem>>, %arg2: memref<256x1xi32, #tpu.memory_space<vmem>>, %arg3: memref<1x1x256xi32, #tpu.memory_space<vmem>>, %arg4: memref<64x128xf32, #tpu.memory_space<vmem>>, %arg5: memref<64x128xf32, #tpu.memory_space<vmem>>, %arg6: memref<64x384xbf16, #tpu.memory_space<vmem>>, %arg7: memref<256x128xf32, #tpu.memory_space<vmem>>, %arg8: memref<128x128xbf16, #tpu.memory_space<vmem>>, %arg9: memref<1x128xf32, #tpu.memory_space<vmem>>, %arg10: memref<2x128xf32, #tpu.memory_space<vmem>>, %arg11: memref<2x128xf32, #tpu.memory_space<vmem>>, %arg12: memref<64x128xf32, #tpu.memory_space<vmem>>, %arg13: memref<256x128xf32, #tpu.memory_space<vmem>>, %arg14: memref<64x256xf32, #tpu.memory_space<vmem>>, %arg15: memref<256x64xi32, #tpu.memory_space<vmem>>, %arg16: memref<64x256xi32, #tpu.memory_space<vmem>>) attributes {dimension_semantics = [#tpu.dimension_semantics<arbitrary>], iteration_bounds = array<i64: 2>, scalar_prefetch = 0 : i64, scratch_operands = 3 : i64, tpu.core_type = #tpu.core_type<tc>, window_params = [{transform_indices = @transform_0, window_bounds = array<i64: 256, 1>}, {transform_indices = @transform_1, window_bounds = array<i64: 256, 1>}, {transform_indices = @transform_2, window_bounds = array<i64: 1, 1, 256>}, {pipeline_mode = #tpu.pipeline_mode<synchronous>, transform_indices = @transform_3, window_bounds = array<i64: 64, 128>}, {pipeline_mode = #tpu.pipeline_mode<synchronous>, transform_indices = @transform_4, window_bounds = array<i64: 64, 128>}, {pipeline_mode = #tpu.pipeline_mode<synchronous>, transform_indices = @transform_5, window_bounds = array<i64: 64, 384>}, {transform_indices = @transform_6, window_bounds = array<i64: 256, 128>}, {pipeline_mode = #tpu.pipeline_mode<synchronous>, transform_indices = @transform_7, window_bounds = array<i64: 128, 128>}, {pipeline_mode = #tpu.pipeline_mode<synchronous>, transform_indices = @transform_8, window_bounds = array<i64: 1, 128>}, {pipeline_mode = #tpu.pipeline_mode<synchronous>, transform_indices = @transform_9, window_bounds = array<i64: 2, 128>}, {pipeline_mode = #tpu.pipeline_mode<synchronous>, transform_indices = @transform_10, window_bounds = array<i64: 2, 128>}, {pipeline_mode = #tpu.pipeline_mode<synchronous>, transform_indices = @transform_11, window_bounds = array<i64: 64, 128>}, {transform_indices = @transform_12, window_bounds = array<i64: 256, 128>}]} {
    %c0_i32 = arith.constant 0 : i32
    %0 = arith.cmpi eq, %arg0, %c0_i32 : i32
    %1 = arith.extui %0 : i1 to i32
    %c0_i32_0 = arith.constant 0 : i32
    %2 = arith.cmpi ne, %1, %c0_i32_0 : i32
    scf.if %2 {
      %cst_37 = arith.constant 0.000000e+00 : f32
      %65 = vector.broadcast %cst_37 : f32 to vector<64x256xf32>
      %c0_38 = arith.constant 0 : index
      %c0_39 = arith.constant 0 : index
      %66 = vector.load %arg14[%c0_38, %c0_39] : memref<64x256xf32, #tpu.memory_space<vmem>>, vector<64x256xf32>
      tpu.vector_store %arg14[%c0_38, %c0_39], %65 {strides = array<i32>} : memref<64x256xf32, #tpu.memory_space<vmem>>, vector<64x256xf32>,
      %67 = tpu.iota {dimensions = array<i32: 1>} : vector<256x64xi32>
      %c0_40 = arith.constant 0 : index
      %c0_41 = arith.constant 0 : index
      %68 = vector.load %arg15[%c0_40, %c0_41] : memref<256x64xi32, #tpu.memory_space<vmem>>, vector<256x64xi32>
      tpu.vector_store %arg15[%c0_40, %c0_41], %67 {strides = array<i32>} : memref<256x64xi32, #tpu.memory_space<vmem>>, vector<256x64xi32>,
      %69 = tpu.iota {dimensions = array<i32: 0>} : vector<64x256xi32>
      %c0_42 = arith.constant 0 : index
      %c0_43 = arith.constant 0 : index
      %70 = vector.load %arg16[%c0_42, %c0_43] : memref<64x256xi32, #tpu.memory_space<vmem>>, vector<64x256xi32>
      tpu.vector_store %arg16[%c0_42, %c0_43], %69 {strides = array<i32>} : memref<64x256xi32, #tpu.memory_space<vmem>>, vector<64x256xi32>,
    } else {
    }
    %c0 = arith.constant 0 : index
    %c0_1 = arith.constant 0 : index
    %3 = vector.load %arg1[%c0, %c0_1] : memref<256x1xi32, #tpu.memory_space<vmem>>, vector<256x1xi32>
    %c0_2 = arith.constant 0 : index
    %c0_3 = arith.constant 0 : index
    %4 = vector.load %arg2[%c0_2, %c0_3] : memref<256x1xi32, #tpu.memory_space<vmem>>, vector<256x1xi32>
    %c0_4 = arith.constant 0 : index
    %c0_5 = arith.constant 0 : index
    %c0_6 = arith.constant 0 : index
    %5 = vector.load %arg3[%c0_4, %c0_5, %c0_6] : memref<1x1x256xi32, #tpu.memory_space<vmem>>, vector<1x1x256xi32>
    %6 = vector.shape_cast %5 : vector<1x1x256xi32> to vector<1x256xi32>
    %c0_7 = arith.constant 0 : index
    %c0_8 = arith.constant 0 : index
    %7 = vector.load %arg7[%c0_7, %c0_8] : memref<256x128xf32, #tpu.memory_space<vmem>>, vector<256x128xf32>
    %c0_9 = arith.constant 0 : index
    %c0_10 = arith.constant 0 : index
    %8 = vector.load %arg15[%c0_9, %c0_10] : memref<256x64xi32, #tpu.memory_space<vmem>>, vector<256x64xi32>
    %9 = vector.broadcast %3 : vector<256x1xi32> to vector<256x64xi32>
    %10 = arith.cmpi eq, %8, %9 : vector<256x64xi32>
    %11 = arith.extui %10 : vector<256x64xi1> to vector<256x64xi32>
    %12 = arith.sitofp %11 : vector<256x64xi32> to vector<256x64xf32>
    %13 = arith.truncf %12 : vector<256x64xf32> to vector<256x64xbf16>
    %c0_11 = arith.constant 0 : index
    %c0_12 = arith.constant 0 : index
    %14 = vector.load %arg15[%c0_11, %c0_12] : memref<256x64xi32, #tpu.memory_space<vmem>>, vector<256x64xi32>
    %15 = vector.broadcast %4 : vector<256x1xi32> to vector<256x64xi32>
    %16 = arith.cmpi eq, %14, %15 : vector<256x64xi32>
    %17 = arith.extui %16 : vector<256x64xi1> to vector<256x64xi32>
    %18 = arith.sitofp %17 : vector<256x64xi32> to vector<256x64xf32>
    %19 = arith.truncf %18 : vector<256x64xf32> to vector<256x64xbf16>
    %c0_13 = arith.constant 0 : index
    %c0_14 = arith.constant 0 : index
    %20 = vector.load %arg16[%c0_13, %c0_14] : memref<64x256xi32, #tpu.memory_space<vmem>>, vector<64x256xi32>
    %21 = vector.broadcast %6 : vector<1x256xi32> to vector<64x256xi32>
    %22 = arith.cmpi eq, %20, %21 : vector<64x256xi32>
    %23 = arith.extui %22 : vector<64x256xi1> to vector<64x256xi32>
    %24 = arith.sitofp %23 : vector<64x256xi32> to vector<64x256xf32>
    %25 = arith.truncf %24 : vector<64x256xf32> to vector<64x256xbf16>
    %26 = arith.truncf %7 : vector<256x128xf32> to vector<256x128xbf16>
    %c0_15 = arith.constant 0 : index
    %c0_16 = arith.constant 0 : index
    %27 = vector.load %arg8[%c0_15, %c0_16] : memref<128x128xbf16, #tpu.memory_space<vmem>>, vector<128x128xbf16>
    %cst = arith.constant dense<0.000000e+00> : vector<256x128xf32>
    %28 = tpu.matmul %26, %27, %cst {dimension_numbers = #tpu.dot_dimension_numbers<[1], [0], [0], [1], [0, 0, 1, 1], [], []>} : vector<256x128xbf16>, vector<128x128xbf16>, vector<256x128xf32> -> vector<256x128xf32>
    %c0_17 = arith.constant 0 : index
    %c0_18 = arith.constant 0 : index
    %29 = vector.load %arg9[%c0_17, %c0_18] : memref<1x128xf32, #tpu.memory_space<vmem>>, vector<1x128xf32>
    %30 = vector.broadcast %29 : vector<1x128xf32> to vector<256x128xf32>
    %31 = arith.addf %28, %30 : vector<256x128xf32>
    %c0_19 = arith.constant 0 : index
    %c0_20 = arith.constant 0 : index
    %32 = vector.load %arg6[%c0_19, %c0_20] : memref<64x384xbf16, #tpu.memory_space<vmem>>, vector<64x256xbf16>
    %cst_21 = arith.constant dense<0.000000e+00> : vector<256x256xf32>
    %33 = tpu.matmul %13, %32, %cst_21 {dimension_numbers = #tpu.dot_dimension_numbers<[1], [0], [0], [1], [0, 0, 1, 1], [], []>} : vector<256x64xbf16>, vector<64x256xbf16>, vector<256x256xf32> -> vector<256x256xf32>
    %c0_22 = arith.constant 0 : index
    %c256 = arith.constant 256 : index
    %34 = vector.load %arg6[%c0_22, %c256] : memref<64x384xbf16, #tpu.memory_space<vmem>>, vector<64x128xbf16>
    %cst_23 = arith.constant dense<0.000000e+00> : vector<256x128xf32>
    %35 = tpu.matmul %19, %34, %cst_23 {dimension_numbers = #tpu.dot_dimension_numbers<[1], [0], [0], [1], [0, 0, 1, 1], [], []>} : vector<256x64xbf16>, vector<64x128xbf16>, vector<256x128xf32> -> vector<256x128xf32>
    %36 = vector.extract_strided_slice %33 {offsets = [0, 0], sizes = [256, 128], strides = [1, 1]} : vector<256x256xf32> to vector<256x128xf32>
    %37 = vector.extract_strided_slice %33 {offsets = [0, 128], sizes = [256, 128], strides = [1, 1]} : vector<256x256xf32> to vector<256x128xf32>
    %38 = arith.addf %36, %35 : vector<256x128xf32>
    %39 = arith.addf %38, %31 : vector<256x128xf32>
    %40 = arith.negf %39 : vector<256x128xf32>
    %41 = math.exp %40 : vector<256x128xf32>
    %cst_24 = arith.constant 1.000000e+00 : f32
    %42 = vector.broadcast %cst_24 : f32 to vector<256x128xf32>
    %43 = arith.addf %42, %41 : vector<256x128xf32>
    %44 = arith.divf %42, %43 : vector<256x128xf32>
    %45 = arith.mulf %37, %44 : vector<256x128xf32>
    %46 = tpu.concatenate %45, %44 in 1 : vector<256x128xf32>, vector<256x128xf32> -> vector<256x256xf32>
    %47 = arith.truncf %46 : vector<256x256xf32> to vector<256x256xbf16>
    %c0_25 = arith.constant 0 : index
    %c0_26 = arith.constant 0 : index
    %48 = vector.load %arg14[%c0_25, %c0_26] : memref<64x256xf32, #tpu.memory_space<vmem>>, vector<64x256xf32>
    %cst_27 = arith.constant dense<0.000000e+00> : vector<64x256xf32>
    %49 = tpu.matmul %25, %47, %cst_27 {dimension_numbers = #tpu.dot_dimension_numbers<[1], [0], [0], [1], [0, 0, 1, 1], [], []>} : vector<64x256xbf16>, vector<256x256xbf16>, vector<64x256xf32> -> vector<64x256xf32>
    %50 = arith.addf %48, %49 : vector<64x256xf32>
    %c0_28 = arith.constant 0 : index
    %c0_29 = arith.constant 0 : index
    %51 = vector.load %arg14[%c0_28, %c0_29] : memref<64x256xf32, #tpu.memory_space<vmem>>, vector<64x256xf32>
    tpu.vector_store %arg14[%c0_28, %c0_29], %50 {strides = array<i32>} : memref<64x256xf32, #tpu.memory_space<vmem>>, vector<64x256xf32>,
    %c0_30 = arith.constant 0 : index
    %c0_31 = arith.constant 0 : index
    %52 = vector.load %arg11[%c0_30, %c0_31] : memref<2x128xf32, #tpu.memory_space<vmem>>, vector<1x128xf32>
    %53 = vector.broadcast %52 : vector<1x128xf32> to vector<256x128xf32>
    %54 = arith.mulf %39, %53 : vector<256x128xf32>
    %c1 = arith.constant 1 : index
    %c0_32 = arith.constant 0 : index
    %55 = vector.load %arg11[%c1, %c0_32] : memref<2x128xf32, #tpu.memory_space<vmem>>, vector<1x128xf32>
    %56 = vector.broadcast %55 : vector<1x128xf32> to vector<256x128xf32>
    %57 = arith.addf %54, %56 : vector<256x128xf32>
    %cst_33 = arith.constant 0.000000e+00 : f32
    %58 = vector.broadcast %cst_33 : f32 to vector<256x128xf32>
    %59 = arith.maximumf %57, %58 : vector<256x128xf32>
    %60 = arith.addf %7, %59 : vector<256x128xf32>
    %c0_34 = arith.constant 0 : index
    %c0_35 = arith.constant 0 : index
    %61 = vector.load %arg13[%c0_34, %c0_35] : memref<256x128xf32, #tpu.memory_space<vmem>>, vector<256x128xf32>
    tpu.vector_store %arg13[%c0_34, %c0_35], %60 {strides = array<i32>} : memref<256x128xf32, #tpu.memory_space<vmem>>, vector<256x128xf32>,
    %c1_i32 = arith.constant 1 : i32
    %62 = arith.cmpi eq, %arg0, %c1_i32 : i32
    %63 = arith.extui %62 : i1 to i32
    %c0_i32_36 = arith.constant 0 : i32
    %64 = arith.cmpi ne, %63, %c0_i32_36 : i32
    scf.if %64 {
      %c0_37 = arith.constant 0 : index
      %c0_38 = arith.constant 0 : index
      %65 = vector.load %arg14[%c0_37, %c0_38] : memref<64x256xf32, #tpu.memory_space<vmem>>, vector<64x128xf32>
      %c0_39 = arith.constant 0 : index
      %c128 = arith.constant 128 : index
      %66 = vector.load %arg14[%c0_39, %c128] : memref<64x256xf32, #tpu.memory_space<vmem>>, vector<64x128xf32>
      %cst_40 = arith.constant 9.99999997E-7 : f32
      %67 = vector.broadcast %cst_40 : f32 to vector<64x128xf32>
      %68 = arith.addf %66, %67 : vector<64x128xf32>
      %69 = tpu.reciprocal %68 {approx = true} : vector<64x128xf32> -> vector<64x128xf32>
      %70 = arith.mulf %68, %69 : vector<64x128xf32>
      %cst_41 = arith.constant 2.000000e+00 : f32
      %71 = vector.broadcast %cst_41 : f32 to vector<64x128xf32>
      %72 = arith.subf %71, %70 : vector<64x128xf32>
      %73 = arith.mulf %69, %72 : vector<64x128xf32>
      %c0_42 = arith.constant 0 : index
      %c0_43 = arith.constant 0 : index
      %74 = vector.load %arg5[%c0_42, %c0_43] : memref<64x128xf32, #tpu.memory_space<vmem>>, vector<64x128xf32>
      %75 = arith.mulf %65, %73 : vector<64x128xf32>
      %76 = arith.addf %74, %75 : vector<64x128xf32>
      %c0_44 = arith.constant 0 : index
      %c0_45 = arith.constant 0 : index
      %77 = vector.load %arg10[%c0_44, %c0_45] : memref<2x128xf32, #tpu.memory_space<vmem>>, vector<1x128xf32>
      %78 = vector.broadcast %77 : vector<1x128xf32> to vector<64x128xf32>
      %79 = arith.mulf %76, %78 : vector<64x128xf32>
      %c1_46 = arith.constant 1 : index
      %c0_47 = arith.constant 0 : index
      %80 = vector.load %arg10[%c1_46, %c0_47] : memref<2x128xf32, #tpu.memory_space<vmem>>, vector<1x128xf32>
      %81 = vector.broadcast %80 : vector<1x128xf32> to vector<64x128xf32>
      %82 = arith.addf %79, %81 : vector<64x128xf32>
      %c0_48 = arith.constant 0 : index
      %c0_49 = arith.constant 0 : index
      %83 = vector.load %arg4[%c0_48, %c0_49] : memref<64x128xf32, #tpu.memory_space<vmem>>, vector<64x128xf32>
      %cst_50 = arith.constant 0.000000e+00 : f32
      %84 = vector.broadcast %cst_50 : f32 to vector<64x128xf32>
      %85 = arith.maximumf %82, %84 : vector<64x128xf32>
      %86 = arith.addf %83, %85 : vector<64x128xf32>
      %c0_51 = arith.constant 0 : index
      %c0_52 = arith.constant 0 : index
      %87 = vector.load %arg12[%c0_51, %c0_52] : memref<64x128xf32, #tpu.memory_space<vmem>>, vector<64x128xf32>
      tpu.vector_store %arg12[%c0_51, %c0_52], %86 {strides = array<i32>} : memref<64x128xf32, #tpu.memory_space<vmem>>, vector<64x128xf32>,
    } else {
    }
    return
  }
  func.func @transform_0(%arg0: i32) -> (i32, i32) {
    %c0_i32 = arith.constant 0 : i32
    %c0_i32_0 = arith.constant 0 : i32
    return %arg0, %c0_i32 : i32, i32
  }
  func.func @transform_1(%arg0: i32) -> (i32, i32) {
    %c0_i32 = arith.constant 0 : i32
    %c0_i32_0 = arith.constant 0 : i32
    return %arg0, %c0_i32 : i32, i32
  }
  func.func @transform_2(%arg0: i32) -> (i32, i32, i32) {
    %c0_i32 = arith.constant 0 : i32
    %c0_i32_0 = arith.constant 0 : i32
    %c0_i32_1 = arith.constant 0 : i32
    return %arg0, %c0_i32, %c0_i32_0 : i32, i32, i32
  }
  func.func @transform_3(%arg0: i32) -> (i32, i32) {
    %c0_i32 = arith.constant 0 : i32
    %c0_i32_0 = arith.constant 0 : i32
    %c0_i32_1 = arith.constant 0 : i32
    return %c0_i32, %c0_i32_0 : i32, i32
  }
  func.func @transform_4(%arg0: i32) -> (i32, i32) {
    %c0_i32 = arith.constant 0 : i32
    %c0_i32_0 = arith.constant 0 : i32
    %c0_i32_1 = arith.constant 0 : i32
    return %c0_i32, %c0_i32_0 : i32, i32
  }
  func.func @transform_5(%arg0: i32) -> (i32, i32) {
    %c0_i32 = arith.constant 0 : i32
    %c0_i32_0 = arith.constant 0 : i32
    %c0_i32_1 = arith.constant 0 : i32
    return %c0_i32, %c0_i32_0 : i32, i32
  }
  func.func @transform_6(%arg0: i32) -> (i32, i32) {
    %c0_i32 = arith.constant 0 : i32
    %c0_i32_0 = arith.constant 0 : i32
    return %arg0, %c0_i32 : i32, i32
  }
  func.func @transform_7(%arg0: i32) -> (i32, i32) {
    %c0_i32 = arith.constant 0 : i32
    %c0_i32_0 = arith.constant 0 : i32
    %c0_i32_1 = arith.constant 0 : i32
    return %c0_i32, %c0_i32_0 : i32, i32
  }
  func.func @transform_8(%arg0: i32) -> (i32, i32) {
    %c0_i32 = arith.constant 0 : i32
    %c0_i32_0 = arith.constant 0 : i32
    %c0_i32_1 = arith.constant 0 : i32
    return %c0_i32, %c0_i32_0 : i32, i32
  }
  func.func @transform_9(%arg0: i32) -> (i32, i32) {
    %c0_i32 = arith.constant 0 : i32
    %c0_i32_0 = arith.constant 0 : i32
    %c0_i32_1 = arith.constant 0 : i32
    return %c0_i32, %c0_i32_0 : i32, i32
  }
  func.func @transform_10(%arg0: i32) -> (i32, i32) {
    %c0_i32 = arith.constant 0 : i32
    %c0_i32_0 = arith.constant 0 : i32
    %c0_i32_1 = arith.constant 0 : i32
    return %c0_i32, %c0_i32_0 : i32, i32
  }
  func.func @transform_11(%arg0: i32) -> (i32, i32) {
    %c0_i32 = arith.constant 0 : i32
    %c0_i32_0 = arith.constant 0 : i32
    %c0_i32_1 = arith.constant 0 : i32
    return %c0_i32, %c0_i32_0 : i32, i32
  }
  func.func @transform_12(%arg0: i32) -> (i32, i32) {
    %c0_i32 = arith.constant 0 : i32
    %c0_i32_0 = arith.constant 0 : i32
    return %arg0, %c0_i32 : i32, i32
  }
}

</mosaic_0001>

<bundles_post_ra>
// kernel: tpu_custom_call.1
= control target key start
LH: loop header
LB: loop body
LE: loop exit
PB: predicated region body
PF: predicated region fallthrough
CT: control target
= control target key end

     0   :  { %s4838_s0 = inlined_call_operand.vmem [shape: s32[512,1], index: 0, kind: input, shape index: {}]   ;;  %s4839_s1 = inlined_call_operand.vmem [shape: s32[512,1], index: 1, kind: input, shape index: {}]   ;;  %s4840_s2 = inlined_call_operand.vmem [shape: s32[2,1,256], index: 2, kind: input, shape index: {}]   ;;  %s4841_s3 = inlined_call_operand.vmem [shape: f32[64,128], index: 3, kind: input, shape index: {}]   ;;  %s4842_s4 = inlined_call_operand.vmem [shape: f32[64,128], index: 4, kind: input, shape index: {}]   ;;  %s4843_s5 = inlined_call_operand.vmem [shape: bf16[64,384], index: 5, kind: input, shape index: {}]   ;;  %s4844_s6 = inlined_call_operand.vmem [shape: f32[512,128], index: 6, kind: input, shape index: {}]   ;;  %s4845_s7 = inlined_call_operand.vmem [shape: bf16[128,128], index: 7, kind: input, shape index: {}]   ;;  %s4846_s8 = inlined_call_operand.vmem [shape: f32[1,128], index: 8, kind: input, shape index: {}]   ;;  %s4847_s9 = inlined_call_operand.vmem [shape: f32[2,128], index: 9, kind: input, shape index: {}]   ;;  %s4848_s10 = inlined_call_operand.vmem [shape: f32[2,128], index: 10, kind: input, shape index: {}]   ;;  %s4849_s11 = inlined_call_operand.hbm [shape: f32[64,128], index: 11, kind: output, shape index: {0}]   ;;  %s4850_s12 = inlined_call_operand.hbm [shape: f32[512,128], index: 12, kind: output, shape index: {1}]  }
   0x1   :  { %4859 = sst [smem:[#allocation23_spill]] %s4849_s11 }
   0x2   :  { %4860 = sst [smem:[#allocation24_spill]] %s4850_s12 }
   0x3   :  { %18 = vsyncpa [#allocation6], 0 }
   0x4   :  { %19 = vsyncpa [#allocation8], 0 }
   0x5   :  { %21 = vsyncpa [#allocation8 + $0x1], 0  ;;  %s3641_s21 = smov 0   ;;  %s3643_s22 = smov 0  }
   0x6   :  { %s3645_s23 = smov 0   ;;  %s3647_s24 = smov 0  }
   0x7 LB: > { %4861 = sst [smem:[#allocation11_spill]] %s3554_s21  ;;  %s3662_s25 = sadd.s32 4294967295, %s3566_s24   ;;  %s3566_s24 = sphi %s3647_s24, %s4887_s24   ;;  %s3562_s23 = sphi %s3645_s23, %s4889_s23   ;;  %s3558_s22 = sphi %s3643_s22, %s4891_s22   ;;  %s3554_s21 = sphi %s3641_s21, %s4890_s21  }
   0x8   : > { %4862 = sst [smem:[#allocation12_spill]] %s3562_s23  ;;  %s2851_s26 = sadd.s32 4294967294, %s3566_s24  }
   0x9   : > { %4863 = sst [smem:[#allocation13_spill]] %s3566_s24  ;;  %s3666_s27 = sadd.s32 1, %s3566_s24  }
   0xa   : > { %4864 = sst [smem:[#allocation14_spill]] %s3666_s27  ;;  %s306_s28 = sadd.s32 1, %s3562_s23 }
   0xb   : > { %s303_s29 = ssub.s32 %s3566_s24, %s3666_s27  ;;  %p316_p0 = scmp.ne.s32.totalorder %s3562_s23, %s3558_s22 }
   0xc   : > { %p304_p1 = scmp.eq.s32.totalorder %s303_s29, 0  ;;  %p317_p2 = scmp.eq.s32.totalorder %s3662_s25, 1 }
   0xd   : > { %p322_p3 = scmp.ne.s32.totalorder %s3558_s22, %s3554_s21  ;;  %p323_p4 = scmp.eq.s32.totalorder %s2851_s26, 1 }
   0xe   : > { %s3677_s30 = scalar_select %p304_p1, %s3562_s23, %s306_s28  }
   0xf   : > { %p3681_p5 = por %p317_p2, %p316_p0  ;;  %p3685_p6 = por %p323_p4, %p322_p3 }
  0x10   : > { %4865 = sst [smem:[#allocation15_spill]] %s3677_s30  ;;  %p2854_p7 = scmp.ge.s32.totalorder %s3566_s24, 1 }
  0x11   : > { %s4867_s14 = scalar_select %p3685_p6, 1, 0 }
  0x12   : > { %p396_p8 = scmp.lt.s32.totalorder %s3566_s24, 3 }
  0x13   : > { %4868 = sst [smem:[#allocation16_spill]] %s4867_s14 }
  0x14   : > { %p397_p9 = pnand %p2854_p7, %p396_p8 }
  0x16   : > { %400 = sbr.rel (%p397_p9) target bundleno = 899 (0x383), region = 64 }
  0x1b   : > { %s4856_s15 = sand.u32 1, %s3558_s22   ;;  %s2856_s16 = sshll.u32 %s3662_s25, 5 }
  0x1c   : > { %s2855_s17 = sshll.u32 %s4856_s15, 8  ;;  %p453_p10 = scmp.lt.s32.totalorder %s2856_s16, 63 }
  0x1d   : > { %p464_p11 = scmp.lt.s32.totalorder %s3662_s25, 1  ;;  %s3717_s11 = scalar_lea.vmem [#allocation7], %s2855_s17 }
  0x1e   : > { %s4893_s16 = smov (!%p453_p10, %s2856_s16), 63  ;;  %p2863_p12 = scmp.ne.s32.totalorder %s3662_s25, 0 }
  0x1f   : > { %s465_s18 = scalar_select %p464_p11, %s3662_s25, 1 }
  0x20   : > { %s2857_s19 = sshll.u32 %s4893_s16, 3  ;;  %479 = sbr.rel (%p2863_p12) target bundleno = 70 (0x46), region = 68 }
  0x21   : > { %s3700_s28 = scalar_lea.vmem %s4838_s0, %s2857_s19  ;;  %s3705_s23 = scalar_lea.vmem %s4839_s1, %s2857_s19 }
  0x22   : > { %s2860_s27 = sshll.u32 %s465_s18, 1  ;;  %s3710_s15 = scalar_lea.vmem %s4844_s6, %s2857_s19 }
  0x23   : > { %s3715_s16 = scalar_lea.vmem %s4840_s2, %s2860_s27 }
  0x25   : > { %v496_v0 = vlaneseq  ;;  %v3568_v1 = vmov 0.0   ;;  %vm498_vm0 = vcmask 523264  }
  0x26   : > { %480 = vst [vmem:[#allocation2 + $0x30] sm:$0xff] %v3568_v1  ;;  %481 = vst [vmem:[#allocation2] sm:$0xff] %v3568_v1 }
  0x27   : > { %482 = vst [vmem:[#allocation2 + $0x58] sm:$0xff] %v3568_v1  ;;  %483 = vst [vmem:[#allocation2 + $0x18] sm:$0xff] %v3568_v1  ;;  %v497_v2 = vand.u32 127, %v496_v0  ;;  %v532_v3 = vshrl.u32 %v496_v0, 7 }
  0x28   : > { %484 = vst [vmem:[#allocation2 + $0x50] sm:$0xff] %v3568_v1  ;;  %485 = vst [vmem:[#allocation2 + $0x68] sm:$0xff] %v3568_v1 }
  0x29   : > { %486 = vst [vmem:[#allocation2 + $0x8] sm:$0xff] %v3568_v1  ;;  %487 = vst [vmem:[#allocation2 + $0x48] sm:$0xff] %v3568_v1  ;;  %v533_v4 = vadd.s32 8, %v532_v3  ;;  %v534_v5 = vadd.s32 16, %v532_v3  ;;  %v535_v6 = vadd.s32 24, %v532_v3  ;;  %v536_v7 = vadd.s32 32, %v532_v3 }
  0x2a   : > { %488 = vst [vmem:[#allocation2 + $0x40] sm:$0xff] %v3568_v1  ;;  %489 = vst [vmem:[#allocation2 + $0x20] sm:$0xff] %v3568_v1  ;;  %v537_v8 = vadd.s32 40, %v532_v3  ;;  %v538_v9 = vadd.s32 48, %v532_v3  ;;  %v539_v10 = vadd.s32 56, %v532_v3 }
  0x2b   : > { %490 = vst [vmem:[#allocation2 + $0x10] sm:$0xff] %v3568_v1  ;;  %491 = vst [vmem:[#allocation2 + $0x38] sm:$0xff] %v3568_v1 }
  0x2c   : > { %492 = vst [vmem:[#allocation2 + $0x60] sm:$0xff] %v3568_v1  ;;  %493 = vst [vmem:[#allocation2 + $0x70] sm:$0xff] %v3568_v1 }
  0x2d   : > { %494 = vst [vmem:[#allocation2 + $0x78] sm:$0xff] %v3568_v1  ;;  %495 = vst [vmem:[#allocation2 + $0x28] sm:$0xff] %v3568_v1 }
  0x2e   : > { %499 = vst.msk [vmem:[#allocation3] sm:$0xff] %vm498_vm0, %v497_v2  ;;  %500 = vst.msk [vmem:[#allocation3 + $0x8] sm:$0xff] %vm498_vm0, %v497_v2 }
  0x2f   : > { %501 = vst.msk [vmem:[#allocation3 + $0x10] sm:$0xff] %vm498_vm0, %v497_v2  ;;  %502 = vst.msk [vmem:[#allocation3 + $0x18] sm:$0xff] %vm498_vm0, %v497_v2 }
  0x30   : > { %503 = vst.msk [vmem:[#allocation3 + $0x20] sm:$0xff] %vm498_vm0, %v497_v2  ;;  %504 = vst.msk [vmem:[#allocation3 + $0x28] sm:$0xff] %vm498_vm0, %v497_v2 }
  0x31   : > { %505 = vst.msk [vmem:[#allocation3 + $0x30] sm:$0xff] %vm498_vm0, %v497_v2  ;;  %506 = vst.msk [vmem:[#allocation3 + $0x38] sm:$0xff] %vm498_vm0, %v497_v2 }
  0x32   : > { %507 = vst.msk [vmem:[#allocation3 + $0x40] sm:$0xff] %vm498_vm0, %v497_v2  ;;  %508 = vst.msk [vmem:[#allocation3 + $0x48] sm:$0xff] %vm498_vm0, %v497_v2 }
  0x33   : > { %509 = vst.msk [vmem:[#allocation3 + $0x50] sm:$0xff] %vm498_vm0, %v497_v2  ;;  %510 = vst.msk [vmem:[#allocation3 + $0x58] sm:$0xff] %vm498_vm0, %v497_v2 }
  0x34   : > { %511 = vst.msk [vmem:[#allocation3 + $0x60] sm:$0xff] %vm498_vm0, %v497_v2  ;;  %512 = vst.msk [vmem:[#allocation3 + $0x68] sm:$0xff] %vm498_vm0, %v497_v2 }
  0x35   : > { %513 = vst.msk [vmem:[#allocation3 + $0x70] sm:$0xff] %vm498_vm0, %v497_v2  ;;  %514 = vst.msk [vmem:[#allocation3 + $0x78] sm:$0xff] %vm498_vm0, %v497_v2 }
  0x36   : > { %515 = vst.msk [vmem:[#allocation3 + $0x80] sm:$0xff] %vm498_vm0, %v497_v2  ;;  %516 = vst.msk [vmem:[#allocation3 + $0x88] sm:$0xff] %vm498_vm0, %v497_v2 }
  0x37   : > { %517 = vst.msk [vmem:[#allocation3 + $0x90] sm:$0xff] %vm498_vm0, %v497_v2  ;;  %518 = vst.msk [vmem:[#allocation3 + $0x98] sm:$0xff] %vm498_vm0, %v497_v2 }
  0x38   : > { %519 = vst.msk [vmem:[#allocation3 + $0xa0] sm:$0xff] %vm498_vm0, %v497_v2  ;;  %520 = vst.msk [vmem:[#allocation3 + $0xa8] sm:$0xff] %vm498_vm0, %v497_v2 }
  0x39   : > { %521 = vst.msk [vmem:[#allocation3 + $0xb0] sm:$0xff] %vm498_vm0, %v497_v2  ;;  %522 = vst.msk [vmem:[#allocation3 + $0xb8] sm:$0xff] %vm498_vm0, %v497_v2 }
  0x3a   : > { %523 = vst.msk [vmem:[#allocation3 + $0xc0] sm:$0xff] %vm498_vm0, %v497_v2  ;;  %524 = vst.msk [vmem:[#allocation3 + $0xc8] sm:$0xff] %vm498_vm0, %v497_v2 }
  0x3b   : > { %525 = vst.msk [vmem:[#allocation3 + $0xd0] sm:$0xff] %vm498_vm0, %v497_v2  ;;  %526 = vst.msk [vmem:[#allocation3 + $0xd8] sm:$0xff] %vm498_vm0, %v497_v2 }
  0x3c   : > { %527 = vst.msk [vmem:[#allocation3 + $0xe0] sm:$0xff] %vm498_vm0, %v497_v2  ;;  %528 = vst.msk [vmem:[#allocation3 + $0xe8] sm:$0xff] %vm498_vm0, %v497_v2 }
  0x3d   : > { %529 = vst.msk [vmem:[#allocation3 + $0xf0] sm:$0xff] %vm498_vm0, %v497_v2  ;;  %530 = vst.msk [vmem:[#allocation3 + $0xf8] sm:$0xff] %vm498_vm0, %v497_v2 }
  0x3e   : > { %540 = vst [vmem:[#allocation4 + $0x28] sm:$0xff] %v532_v3  ;;  %541 = vst [vmem:[#allocation4 + $0x68] sm:$0xff] %v532_v3 }
  0x3f   : > { %542 = vst [vmem:[#allocation4 + $0x10] sm:$0xff] %v533_v4  ;;  %543 = vst [vmem:[#allocation4 + $0x40] sm:$0xff] %v533_v4 }
  0x40   : > { %544 = vst [vmem:[#allocation4 + $0x48] sm:$0xff] %v534_v5  ;;  %545 = vst [vmem:[#allocation4 + $0x30] sm:$0xff] %v534_v5 }
  0x41   : > { %546 = vst [vmem:[#allocation4 + $0x70] sm:$0xff] %v535_v6  ;;  %547 = vst [vmem:[#allocation4 + $0x38] sm:$0xff] %v535_v6 }
  0x42   : > { %548 = vst [vmem:[#allocation4 + $0x20] sm:$0xff] %v536_v7  ;;  %549 = vst [vmem:[#allocation4 + $0x78] sm:$0xff] %v536_v7 }
  0x43   : > { %550 = vst [vmem:[#allocation4 + $0x18] sm:$0xff] %v537_v8  ;;  %551 = vst [vmem:[#allocation4 + $0x58] sm:$0xff] %v537_v8 }
  0x44   : > { %552 = vst [vmem:[#allocation4] sm:$0xff] %v538_v9  ;;  %553 = vst [vmem:[#allocation4 + $0x8] sm:$0xff] %v538_v9 }
  0x45   : > { %554 = vst [vmem:[#allocation4 + $0x60] sm:$0xff] %v539_v10  ;;  %555 = vst [vmem:[#allocation4 + $0x50] sm:$0xff] %v539_v10 }
  0x46 PF: > { %v558_v11 = vld [vmem:[%s3700_s28 + $0x10] sm:$0xff]  ;;  %v556_v12 = vld [vmem:[%s3700_s28] sm:$0xff]  ;;  %v3569_v13 = vmov 0   ;;  %v559_v14 = vld [vmem:[%s3700_s28 + $0x18] sm:$0xff]  ;;  %vm1477_vm3 = vcmask 523264   ;;  %p3047_p13 = scmp.ne.s32.totalorder %s3662_s25, 1 }
  0x47   : > { %3275 = vset.pattern.permute.xlu1 %v3569_v13  ;;  %3274 = vset.pattern.permute.xlu0 %v3569_v13  ;;  %v557_v15 = vld [vmem:[%s3700_s28 + $0x8] sm:$0xff]  ;;  %v560_v17 = vld [vmem:[%s3700_s28 + $0x20] sm:$0xff]  ;;  %v563_v18 = vld [vmem:[%s3700_s28 + $0x38] sm:$0xff] }
  0x48   : > { %692 = vperm.xlu1 %3275, %v558_v11   ;;  %686 = vperm.xlu0 %3274, %v556_v12   ;;  %v561_v16 = vld [vmem:[%s3700_s28 + $0x28] sm:$0xff]  ;;  %v562_v19 = vld [vmem:[%s3700_s28 + $0x30] sm:$0xff]  ;;  %v3276_v20 = vld [vmem:[%s4845_s7 + $0x38] sm:$0xff]  }
  0x49   : > { %1558 = vmatprep.mubr.bf16.mxu1 %v3569_v13  ;;  %v565_v21 = vld [vmem:[%s3700_s28 + $0x48] sm:$0xff]  ;;  %v3277_v22 = vld [vmem:[%s4845_s7 + $0x30] sm:$0xff]   ;;  %v564_v23 = vld [vmem:[%s3700_s28 + $0x40] sm:$0xff]  ;;  %3102 = vmatprep.subr.bf16.mxu0 %v3276_v20 }
  0x4a   : > { %3103 = vmatpush3.bf16.msra.mxu0 %v3276_v20  ;;  %v3278_v24 = vld [vmem:[%s4845_s7 + $0x28] sm:$0xff]   ;;  %v567_v25 = vld [vmem:[%s3700_s28 + $0x58] sm:$0xff]  ;;  %v566_v26 = vld [vmem:[%s3700_s28 + $0x50] sm:$0xff] }
  0x4b   : > { %3104 = vmatprep.subr.bf16.mxu0 %v3277_v22  ;;  %v3279_v27 = vld [vmem:[%s4845_s7 + $0x20] sm:$0xff]   ;;  %v569_v28 = vld [vmem:[%s3700_s28 + $0x68] sm:$0xff]  ;;  %v3280_v30 = vld [vmem:[%s4845_s7 + $0x18] sm:$0xff]  }
  0x4c   : > { %695 = vperm.xlu1 %3275, %v559_v14   ;;  %689 = vperm.xlu0 %3274, %v557_v15   ;;  %v568_v29 = vld [vmem:[%s3700_s28 + $0x60] sm:$0xff]  ;;  %v622_v32 = vld [vmem:[%s3710_s15 + $0x8] sm:$0xff]  ;;  %v571_v34 = vld [vmem:[%s3700_s28 + $0x78] sm:$0xff] }
  0x4d   : > { %v621_v31 = vld [vmem:[%s3710_s15] sm:$0xff]  ;;  %v570_v35 = vld [vmem:[%s3700_s28 + $0x70] sm:$0xff]  ;;  %v3284_v37 = vld [vmem:[%s4843_s5 + $0x4c] ss:$12 sps:$4 sm:$0xff]  }
  0x4e   : > { %3105 = vmatpush3.bf16.msra.mxu0 %v3277_v22  ;;  %v1181_v33 = vpack.c.bf16 %v622_v32, %v621_v31  ;;  %v3281_v36 = vld [vmem:[%s4845_s7 + $0x10] sm:$0xff]   ;;  %v589_v38 = vld [vmem:[%s3705_s23 + $0x8] sm:$0xff]  ;;  %v588_v39 = vld [vmem:[%s3705_s23] sm:$0xff]  ;;  %1534 = vmatprep.subr.bf16.mxu1 %v3284_v37 }
  0x4f   : > { %3106 = vmatprep.subr.bf16.mxu0 %v3278_v24  ;;  %v3286_v40 = vld [vmem:[%s4843_s5 + $0x48] ss:$12 sps:$4 sm:$0xff]   ;;  %v572_v44 = vld [vmem:[%s3700_s28 + $0x80] sm:$0xff]  ;;  %v3289_v45 = vld [vmem:[%s4843_s5 + $0x30] ss:$12 sps:$4 sm:$0xff]  }
  0x50   : > { %701 = vperm.xlu1 %3275, %v561_v16   ;;  %698 = vperm.xlu0 %3274, %v560_v17   ;;  %v3282_v41 = vld [vmem:[%s4845_s7 + $0x8] sm:$0xff]   ;;  %v3287_v42 = vld [vmem:[%s4843_s5 + $0x34] ss:$12 sps:$4 sm:$0xff]   ;;  %v3292_v48 = vld [vmem:[%s4843_s5 + $0x18] ss:$12 sps:$4 sm:$0xff]  }
  0x51   : > { %3118 = vmatprep.mubr.bf16.mxu0 %v1181_v33  ;;  %1535 = vmatpush1.bf16.msra.mxu1 %v3286_v40  ;;  %v573_v43 = vld [vmem:[%s3700_s28 + $0x88] sm:$0xff]  ;;  %v3283_v47 = vld [vmem:[%s4845_s7] sm:$0xff]   ;;  %v591_v49 = vld [vmem:[%s3705_s23 + $0x18] sm:$0xff] }
  0x52   : > { %3107 = vmatpush3.bf16.msra.mxu0 %v3278_v24  ;;  %1536 = vmatprep.subr.bf16.mxu1 %v3287_v42  ;;  %v3290_v46 = vld [vmem:[%s4843_s5 + $0x1c] ss:$12 sps:$4 sm:$0xff]   ;;  %v590_v50 = vld [vmem:[%s3705_s23 + $0x10] sm:$0xff]  ;;  %v625_v54 = vld [vmem:[%s3710_s15 + $0x20] sm:$0xff] }
  0x53   : > { %3108 = vmatprep.subr.bf16.mxu0 %v3279_v27  ;;  %v623_v51 = vld [vmem:[%s3710_s15 + $0x10] sm:$0xff]  ;;  %v624_v52 = vld [vmem:[%s3710_s15 + $0x18] sm:$0xff]  ;;  %v626_v55 = vld [vmem:[%s3710_s15 + $0x28] sm:$0xff] }
  0x54   : > { %707 = vperm.xlu1 %3275, %v563_v18   ;;  %704 = vperm.xlu0 %3274, %v562_v19   ;;  %v3293_v53 = vld [vmem:[%s4843_s5 + $0x4] ss:$12 sps:$4 sm:$0xff]   ;;  %v3295_v56 = vld [vmem:[%s4843_s5] ss:$12 sps:$4 sm:$0xff]   ;;  %v1182_v59 = vpack.c.bf16 %v624_v52, %v623_v51  ;;  %v1183_v60 = vpack.c.bf16 %v626_v55, %v625_v54  ;;  %v575_v61 = vld [vmem:[%s3700_s28 + $0x98] sm:$0xff] }
  0x55   : > { %1537 = vmatpush1.bf16.msra.mxu1 %v3289_v45  ;;  %v593_v57 = vld [vmem:[%s3705_s23 + $0x28] sm:$0xff]  ;;  %v592_v58 = vld [vmem:[%s3705_s23 + $0x20] sm:$0xff]  ;;  %v574_v62 = vld [vmem:[%s3700_s28 + $0x90] sm:$0xff] }
  0x56   : > { %3109 = vmatpush3.bf16.msra.mxu0 %v3279_v27  ;;  %1538 = vmatprep.subr.bf16.mxu1 %v3290_v46  ;;  %v627_v63 = vld [vmem:[%s3710_s15 + $0x30] sm:$0xff]  ;;  %v628_v0 = vld [vmem:[%s3710_s15 + $0x38] sm:$0xff]  ;;  %v629_v1 = vld [vmem:[%s3710_s15 + $0x40] sm:$0xff] }
  0x57   : > { %3110 = vmatprep.subr.bf16.mxu0 %v3280_v30  ;;  %v630_v2 = vld [vmem:[%s3710_s15 + $0x48] sm:$0xff]  ;;  %v3296_v3 = vld [vmem:[%s4843_s5 + $0x50] ss:$12 sps:$4 sm:$0xff]   ;;  %v1184_v6 = vpack.c.bf16 %v628_v0, %v627_v63  ;;  %v3297_v7 = vld [vmem:[%s4843_s5 + $0x38] ss:$12 sps:$4 sm:$0xff]  }
  0x58   : > { %713 = vperm.xlu1 %3275, %v565_v21   ;;  %710 = vperm.xlu0 %3274, %v564_v23   ;;  %v595_v4 = vld [vmem:[%s3705_s23 + $0x38] sm:$0xff]  ;;  %v594_v5 = vld [vmem:[%s3705_s23 + $0x30] sm:$0xff]  ;;  %v1185_v8 = vpack.c.bf16 %v630_v2, %v629_v1  ;;  %v597_v9 = vld [vmem:[%s3705_s23 + $0x48] sm:$0xff] }
  0x59   : > { %1539 = vmatpush1.bf16.msra.mxu1 %v3292_v48  ;;  %v596_v10 = vld [vmem:[%s3705_s23 + $0x40] sm:$0xff]  ;;  %v631_v12 = vld [vmem:[%s3710_s15 + $0x50] sm:$0xff]  ;;  %v632_v14 = vld [vmem:[%s3710_s15 + $0x58] sm:$0xff] }
  0x5a   : > { %3111 = vmatpush3.bf16.msra.mxu0 %v3280_v30  ;;  %1540 = vmatprep.subr.bf16.mxu1 %v3293_v53  ;;  %v3298_v11 = vld [vmem:[%s4843_s5 + $0x20] ss:$12 sps:$4 sm:$0xff]   ;;  %v1186_v19 = vpack.c.bf16 %v632_v14, %v631_v12  ;;  %v3299_v20 = vld [vmem:[%s4843_s5 + $0x8] ss:$12 sps:$4 sm:$0xff]   ;;  %v599_v22 = vld [vmem:[%s3705_s23 + $0x58] sm:$0xff] }
  0x5b   : > { %3112 = vmatprep.subr.bf16.mxu0 %v3281_v36  ;;  %v633_v15 = vld [vmem:[%s3710_s15 + $0x60] sm:$0xff]  ;;  %v634_v16 = vld [vmem:[%s3710_s15 + $0x68] sm:$0xff]  ;;  %v598_v23 = vld [vmem:[%s3705_s23 + $0x50] sm:$0xff] }
  0x5c   : > { %719 = vperm.xlu1 %3275, %v567_v25   ;;  %716 = vperm.xlu0 %3274, %v566_v26   ;;  %v577_v17 = vld [vmem:[%s3700_s28 + $0xa8] sm:$0xff]  ;;  %v576_v18 = vld [vmem:[%s3700_s28 + $0xa0] sm:$0xff]  ;;  %v1187_v21 = vpack.c.bf16 %v634_v16, %v633_v15  ;;  %v635_v24 = vld [vmem:[%s3710_s15 + $0x70] sm:$0xff] }
  0x5d   : > { %1541 = vmatpush1.bf16.msra.mxu1 %v3295_v56  ;;  %v636_v25 = vld [vmem:[%s3710_s15 + $0x78] sm:$0xff]  ;;  %v637_v26 = vld [vmem:[%s3710_s15 + $0x80] sm:$0xff]  ;;  %v638_v27 = vld [vmem:[%s3710_s15 + $0x88] sm:$0xff] }
  0x5e   : > { %3113 = vmatpush3.bf16.msra.mxu0 %v3281_v36  ;;  %v1188_v30 = vpack.c.bf16 %v636_v25, %v635_v24  ;;  %v1189_v31 = vpack.c.bf16 %v638_v27, %v637_v26  ;;  %v579_v32 = vld [vmem:[%s3700_s28 + $0xb8] sm:$0xff]  ;;  %v578_v33 = vld [vmem:[%s3700_s28 + $0xb0] sm:$0xff]  ;;  %v641_v36 = vld [vmem:[%s3710_s15 + $0xa0] sm:$0xff]  ;;  %v3570_v24 = vmov 0.0  }
  0x5f   : > { %3114 = vmatprep.subr.bf16.mxu0 %v3282_v41  ;;  %v642_v37 = vld [vmem:[%s3710_s15 + $0xa8] sm:$0xff]  ;;  %v644_v45 = vld [vmem:[%s3710_s15 + $0xb8] sm:$0xff]  ;;  %v645_v46 = vld [vmem:[%s3710_s15 + $0xc0] sm:$0xff] }
  0x60   : > { %725 = vperm.xlu1 %3275, %v569_v28   ;;  %722 = vperm.xlu0 %3274, %v568_v29   ;;  %v601_v28 = vld [vmem:[%s3705_s23 + $0x68] sm:$0xff]  ;;  %v600_v29 = vld [vmem:[%s3705_s23 + $0x60] sm:$0xff]  ;;  %v607_v52 = vld [vmem:[%s3705_s23 + $0x98] sm:$0xff] }
  0x61   : > { %v605_v42 = vld [vmem:[%s3705_s23 + $0x88] sm:$0xff]  ;;  %v606_v53 = vld [vmem:[%s3705_s23 + $0x90] sm:$0xff]  ;;  %v648_v55 = vld [vmem:[%s3710_s15 + $0xd8] sm:$0xff] }
  0x62   : > { %3115 = vmatpush3.bf16.msra.mxu0 %v3282_v41  ;;  %v1191_v41 = vpack.c.bf16 %v642_v37, %v641_v36  ;;  %v581_v48 = vld [vmem:[%s3700_s28 + $0xc8] sm:$0xff]  ;;  %v647_v54 = vld [vmem:[%s3710_s15 + $0xd0] sm:$0xff]  ;;  %v649_v56 = vld [vmem:[%s3710_s15 + $0xe0] sm:$0xff] }
  0x63   : > { %3116 = vmatprep.subr.bf16.mxu0 %v3283_v47  ;;  %v582_v63 = vld [vmem:[%s3700_s28 + $0xd0] sm:$0xff]  ;;  %v652_v1 = vld [vmem:[%s3710_s15 + $0xf8] sm:$0xff]  ;;  %v616_v12 = vld [vmem:[%s3705_s23 + $0xe0] sm:$0xff] }
  0x64   : > { %731 = vperm.xlu1 %3275, %v571_v34   ;;  %728 = vperm.xlu0 %3274, %v570_v35   ;;  %v639_v34 = vld [vmem:[%s3710_s15 + $0x90] sm:$0xff]  ;;  %v640_v35 = vld [vmem:[%s3710_s15 + $0x98] sm:$0xff]  ;;  %v3926_v36 = vld [vmem:[#allocation3 + $0x28] sm:$0xff] }
  0x65   : > { %v1190_v40 = vpack.c.bf16 %v640_v35, %v639_v34  ;;  %v651_v0 = vld [vmem:[%s3710_s15 + $0xf0] sm:$0xff]  ;;  %v611_v2 = vld [vmem:[%s3705_s23 + $0xb8] sm:$0xff]  ;;  %v3928_v37 = vld [vmem:[#allocation3 + $0x20] sm:$0xff] }
  0x66   : > { %3117 = vmatpush3.bf16.msra.mxu0 %v3283_v47  ;;  %v646_v47 = vld [vmem:[%s3710_s15 + $0xc8] sm:$0xff]  ;;  %v587_v14 = vld [vmem:[%s3700_s28 + $0xf8] sm:$0xff]  ;;  %v586_v15 = vld [vmem:[%s3700_s28 + $0xf0] sm:$0xff] }
  0x67   : > { %3150 = vmatprep.subr.bf16.mxu0 %v3296_v3  ;;  %v1193_v51 = vpack.c.bf16 %v646_v47, %v645_v46  ;;  %v619_v16 = vld [vmem:[%s3705_s23 + $0xf8] sm:$0xff]  ;;  %v3938_v46 = vld [vmem:[#allocation3 + $0x30] sm:$0xff] }
  0x68   : > { %897 = vperm.xlu1 %3275, %v589_v38   ;;  %894 = vperm.xlu0 %3274, %v588_v39   ;;  %v603_v38 = vld [vmem:[%s3705_s23 + $0x78] sm:$0xff]  ;;  %v602_v39 = vld [vmem:[%s3705_s23 + $0x70] sm:$0xff] }
  0x69   : > { %3119 = vmatmul.mubr.bf16.vlgmr.msra.gmra.mxu0 %v1182_v59  ;;  %v608_v59 = vld [vmem:[%s3705_s23 + $0xa0] sm:$0xff]  ;;  %v3915_v26 = vld [vmem:[#allocation3 + $0x18] sm:$0xff] }
  0x6a   : > { %3122 = vmatprep.mubr.bf16.mxu0 %v1183_v60  ;;  %3151 = vmatpush3.bf16.msra.mxu0 %v3296_v3  ;;  %v1194_v60 = vpack.c.bf16 %v648_v55, %v647_v54  ;;  %v610_v3 = vld [vmem:[%s3705_s23 + $0xb0] sm:$0xff]  ;;  %v3954_v54 = vld [vmem:[#allocation3 + $0x48] sm:$0xff]  ;;  %v3956_v55 = vld [vmem:[#allocation3 + $0x40] sm:$0xff] }
  0x6b   : > { %3152 = vmatprep.subr.bf16.mxu0 %v3297_v7 }
  0x6c   : > { %737 = vperm.xlu1 %3275, %v573_v43   ;;  %734 = vperm.xlu0 %3274, %v572_v44   ;;  %v604_v43 = vld [vmem:[%s3705_s23 + $0x80] sm:$0xff]  ;;  %v643_v44 = vld [vmem:[%s3710_s15 + $0xb0] sm:$0xff] }
  0x6e   : > { %3153 = vmatpush3.bf16.msra.mxu0 %v3297_v7  ;;  %v585_v7 = vld [vmem:[%s3700_s28 + $0xe8] sm:$0xff] }
  0x6f   : > { %3154 = vmatprep.subr.bf16.mxu0 %v3298_v11 }
  0x70   : > { %903 = vperm.xlu1 %3275, %v591_v49   ;;  %900 = vperm.xlu0 %3274, %v590_v50   ;;  %v580_v49 = vld [vmem:[%s3700_s28 + $0xc0] sm:$0xff]  ;;  %v1192_v50 = vpack.c.bf16 %v644_v45, %v643_v44  ;;  %v3936_v45 = vld [vmem:[#allocation3 + $0x38] sm:$0xff] }
  0x71   : > { %3123 = vmatmul.mubr.bf16.gmra.mxu0 %v1184_v6  ;;  %v612_v6 = vld [vmem:[%s3705_s23 + $0xc0] sm:$0xff] }
  0x72   : > { %3126 = vmatprep.mubr.bf16.mxu0 %v1185_v8  ;;  %3155 = vmatpush3.bf16.msra.mxu0 %v3298_v11  ;;  %v584_v8 = vld [vmem:[%s3700_s28 + $0xe0] sm:$0xff]  ;;  %v617_v11 = vld [vmem:[%s3705_s23 + $0xe8] sm:$0xff] }
  0x73   : > { %3156 = vmatprep.subr.bf16.mxu0 %v3299_v20 }
  0x74   : > { %909 = vperm.xlu1 %3275, %v593_v57   ;;  %906 = vperm.xlu0 %3274, %v592_v58   ;;  %v650_v57 = vld [vmem:[%s3710_s15 + $0xe8] sm:$0xff] }
  0x75   : > { %v609_v58 = vld [vmem:[%s3705_s23 + $0xa8] sm:$0xff] }
  0x76   : > { %3157 = vmatpush3.bf16.msra.mxu0 %v3299_v20 }
  0x78   : > { %743 = vperm.xlu1 %3275, %v575_v61   ;;  %740 = vperm.xlu0 %3274, %v574_v62   ;;  %v1195_v61 = vpack.c.bf16 %v650_v57, %v649_v56  ;;  %v583_v62 = vld [vmem:[%s3700_s28 + $0xd8] sm:$0xff] }
  0x79   : > { %3127 = vmatmul.mubr.bf16.gmra.mxu0 %v1186_v19  ;;  %v3911_v19 = vld [vmem:[#allocation3] sm:$0xff] }
  0x7a   : > { %3130 = vmatprep.mubr.bf16.mxu0 %v1187_v21  ;;  %v654_v21 = vld [vmem:[#allocation3 + $0x8] sm:$0xff] }
  0x7c   : > { %915 = vperm.xlu1 %3275, %v595_v4   ;;  %912 = vperm.xlu0 %3274, %v594_v5   ;;  %v1196_v4 = vpack.c.bf16 %v652_v1, %v651_v0  ;;  %v613_v5 = vld [vmem:[%s3705_s23 + $0xc8] sm:$0xff] }
  0x80   : > { %921 = vperm.xlu1 %3275, %v597_v9   ;;  %918 = vperm.xlu0 %3274, %v596_v10   ;;  %v615_v9 = vld [vmem:[%s3705_s23 + $0xd8] sm:$0xff]  ;;  %v614_v10 = vld [vmem:[%s3705_s23 + $0xd0] sm:$0xff] }
  0x81   : > { %3131 = vmatmul.mubr.bf16.gmra.mxu0 %v1188_v30 }
  0x82   : > { %3134 = vmatprep.mubr.bf16.mxu0 %v1189_v31 }
  0x84   : > { %749 = vperm.xlu1 %3275, %v577_v17   ;;  %746 = vperm.xlu0 %3274, %v576_v18   ;;  %v618_v17 = vld [vmem:[%s3705_s23 + $0xf0] sm:$0xff] }
  0x88   : > { %927 = vperm.xlu1 %3275, %v599_v22   ;;  %924 = vperm.xlu0 %3274, %v598_v23  }
  0x89   : > { %3135 = vmatmul.mubr.bf16.gmra.mxu0 %v1190_v40 }
  0x8a   : > { %3138 = vmatprep.mubr.bf16.mxu0 %v1191_v41 }
  0x8c   : > { %933 = vperm.xlu1 %3275, %v601_v28   ;;  %930 = vperm.xlu0 %3274, %v600_v29   ;;  %v3918_v29 = vld [vmem:[#allocation3 + $0x10] sm:$0xff] }
  0x90   : > { %755 = vperm.xlu1 %3275, %v579_v32   ;;  %752 = vperm.xlu0 %3274, %v578_v33  }
  0x91   : > { %3139 = vmatmul.mubr.bf16.gmra.mxu0 %v1192_v50 }
  0x92   : > { %3142 = vmatprep.mubr.bf16.mxu0 %v1193_v51 }
  0x94   : > { %939 = vperm.xlu1 %3275, %v603_v38   ;;  %936 = vperm.xlu0 %3274, %v602_v39  }
  0x98   : > { %945 = vperm.xlu1 %3275, %v605_v42   ;;  %942 = vperm.xlu0 %3274, %v604_v43  }
  0x99   : > { %3143 = vmatmul.mubr.bf16.gmra.mxu0 %v1194_v60 }
  0x9a   : > { %3146 = vmatprep.mubr.bf16.mxu0 %v1195_v61 }
  0x9c   : > { %761 = vperm.xlu1 %3275, %v581_v48   ;;  %758 = vperm.xlu0 %3274, %v580_v49  }
  0xa0   : > { %951 = vperm.xlu1 %3275, %v607_v52   ;;  %948 = vperm.xlu0 %3274, %v606_v53  }
  0xa1   : > { %3147 = vmatmul.mubr.bf16.gmra.mxu0 %v1196_v4 }
  0xa4   : > { %957 = vperm.xlu1 %3275, %v609_v58   ;;  %954 = vperm.xlu0 %3274, %v608_v59  }
  0xa8   : > { %767 = vperm.xlu1 %3275, %v583_v62   ;;  %764 = vperm.xlu0 %3274, %v582_v63  }
  0xac   : > { %963 = vperm.xlu1 %3275, %v611_v2   ;;  %960 = vperm.xlu0 %3274, %v610_v3   ;;  %v3972_v2 = vld [vmem:[#allocation3 + $0x58] sm:$0xff]  ;;  %v3974_v3 = vld [vmem:[#allocation3 + $0x50] sm:$0xff] }
  0xb0   : > { %969 = vperm.xlu1 %3275, %v613_v5   ;;  %966 = vperm.xlu0 %3274, %v612_v6  }
  0xb4   : > { %773 = vperm.xlu1 %3275, %v585_v7   ;;  %770 = vperm.xlu0 %3274, %v584_v8  }
  0xb8   : > { %975 = vperm.xlu1 %3275, %v615_v9   ;;  %972 = vperm.xlu0 %3274, %v614_v10  }
  0xbc   : > { %981 = vperm.xlu1 %3275, %v617_v11   ;;  %978 = vperm.xlu0 %3274, %v616_v12  }
  0xc0   : > { %779 = vperm.xlu1 %3275, %v587_v14   ;;  %776 = vperm.xlu0 %3274, %v586_v15   ;;  %v3989_v15 = vld [vmem:[#allocation3 + $0x68] sm:$0xff] }
  0xc3   : > { %v693_v18 = vpop.permute.xlu1 %692  ;;  %v687_v20 = vpop.permute.xlu0 %686 }
  0xc4   : > { %987 = vperm.xlu1 %3275, %v619_v16   ;;  %984 = vperm.xlu0 %3274, %v618_v17   ;;  %vm781_vm1 = vcmp.eq.s32.totalorder %v3911_v19, %v687_v20  ;;  %vm783_vm5 = vcmp.eq.s32.totalorder %v3918_v29, %v693_v18  ;;  %v3991_v16 = vld [vmem:[#allocation3 + $0x60] sm:$0xff] }
  0xc5   : > { %v2864_v25 = vsel %vm781_vm1, 1.0, %v3570_v24  ;;  %v2866_v35 = vsel %vm783_vm5, 1.0, %v3570_v24 }
  0xc7   : > { %v696_v22 = vpop.permute.xlu1 %695  ;;  %v690_v23 = vpop.permute.xlu0 %689 }
  0xc8   : > { %vm782_vm2 = vcmp.eq.s32.totalorder %v654_v21, %v690_v23  ;;  %vm784_vm4 = vcmp.eq.s32.totalorder %v3915_v26, %v696_v22 }
  0xc9   : > { %v2865_v27 = vsel %vm782_vm2, 1.0, %v3570_v24  ;;  %v2867_v32 = vsel %vm784_vm4, 1.0, %v3570_v24 }
  0xca   : > { %v877_v28 = vpack.c.bf16 %v2865_v27, %v2864_v25  ;;  %v878_v38 = vpack.c.bf16 %v2867_v32, %v2866_v35 }
  0xcb   : > { %v702_v30 = vpop.permute.xlu1 %701  ;;  %v699_v31 = vpop.permute.xlu0 %698 }
  0xcc   : > { %2961 = vmatmul.mubr.msk.bf16.vlgmr.msra.gmra.mxu1 %vm1477_vm3, %v877_v28  ;;  %vm786_vm6 = vcmp.eq.s32.totalorder %v3926_v36, %v702_v30  ;;  %vm785_vm7 = vcmp.eq.s32.totalorder %v3928_v37, %v699_v31  ;;  %v4008_v28 = vld [vmem:[#allocation3 + $0x78] sm:$0xff] }
  0xcd   : > { %1568 = vmatprep.mubr.bf16.mxu1 %v3569_v13  ;;  %v2869_v41 = vsel %vm786_vm6, 1.0, %v3570_v24  ;;  %v2868_v42 = vsel %vm785_vm7, 1.0, %v3570_v24 }
  0xce   : > { %v879_v47 = vpack.c.bf16 %v2869_v41, %v2868_v42 }
  0xcf   : > { %v708_v33 = vpop.permute.xlu1 %707  ;;  %v705_v34 = vpop.permute.xlu0 %704 }
  0xd0   : > { %vm788_vm8 = vcmp.eq.s32.totalorder %v3936_v45, %v708_v33  ;;  %vm787_vm9 = vcmp.eq.s32.totalorder %v3938_v46, %v705_v34 }
  0xd1   : > { %v2871_v50 = vsel %vm788_vm8, 1.0, %v3570_v24  ;;  %v2870_v51 = vsel %vm787_vm9, 1.0, %v3570_v24 }
  0xd2   : > { %v880_v56 = vpack.c.bf16 %v2871_v50, %v2870_v51 }
  0xd3   : > { %v714_v39 = vpop.permute.xlu1 %713  ;;  %v711_v40 = vpop.permute.xlu0 %710 }
  0xd4   : > { %2962 = vmatmul.mubr.msk.bf16.gmra.mxu1 %vm1477_vm3, %v878_v38  ;;  %vm790_vm10 = vcmp.eq.s32.totalorder %v3954_v54, %v714_v39  ;;  %vm789_vm11 = vcmp.eq.s32.totalorder %v3956_v55, %v711_v40 }
  0xd5   : > { %1578 = vmatprep.mubr.bf16.mxu1 %v3569_v13  ;;  %v2873_v62 = vsel %vm790_vm10, 1.0, %v3570_v24  ;;  %v2872_v63 = vsel %vm789_vm11, 1.0, %v3570_v24 }
  0xd6   : > { %v881_v4 = vpack.c.bf16 %v2873_v62, %v2872_v63 }
  0xd7   : > { %v720_v43 = vpop.permute.xlu1 %719  ;;  %v717_v44 = vpop.permute.xlu0 %716 }
  0xd8   : > { %vm792_vm14 = vcmp.eq.s32.totalorder %v3972_v2, %v720_v43  ;;  %vm791_vm15 = vcmp.eq.s32.totalorder %v3974_v3, %v717_v44  ;;  %v670_v43 = vld [vmem:[#allocation3 + $0x88] sm:$0xff]  ;;  %v669_v44 = vld [vmem:[#allocation3 + $0x80] sm:$0xff] }
  0xd9   : > { %v2875_v10 = vsel %vm792_vm14, 1.0, %v3570_v24  ;;  %v2874_v11 = vsel %vm791_vm15, 1.0, %v3570_v24 }
  0xdb   : > { %v3940_v48 = vpop.permute.xlu1 %725  ;;  %v3942_v49 = vpop.permute.xlu0 %722 }
  0xdc   : > { %2963 = vmatmul.mubr.msk.bf16.gmra.mxu1 %vm1477_vm3, %v879_v47  ;;  %vm794_vm5 = vcmp.eq.s32.totalorder %v3989_v15, %v3940_v48  ;;  %vm793_vm6 = vcmp.eq.s32.totalorder %v3991_v16, %v3942_v49 }
  0xdd   : > { %1588 = vmatprep.mubr.bf16.mxu1 %v3569_v13  ;;  %v2877_v23 = vsel %vm794_vm5, 1.0, %v3570_v24  ;;  %v2876_v25 = vsel %vm793_vm6, 1.0, %v3570_v24 }
  0xde   : > { %v883_v32 = vpack.c.bf16 %v2877_v23, %v2876_v25 }
  0xdf   : > { %v3950_v52 = vpop.permute.xlu1 %731  ;;  %v3952_v53 = vpop.permute.xlu0 %728 }
  0xe0   : > { %vm796_vm9 = vcmp.eq.s32.totalorder %v4008_v28, %v3950_v52 }
  0xe1   : > { %v2879_v39 = vsel %vm796_vm9, 1.0, %v3570_v24 }
  0xe3   : > { %v898_v57 = vpop.permute.xlu1 %897  ;;  %v895_v58 = vpop.permute.xlu0 %894 }
  0xe4   : > { %vm990_vm12 = vcmp.eq.s32.totalorder %v654_v21, %v898_v57  ;;  %vm989_vm13 = vcmp.eq.s32.totalorder %v3911_v19, %v895_v58  ;;  %2964 = vmatmul.mubr.msk.bf16.gmra.mxu1 %vm1477_vm3, %v880_v56  ;;  %v882_v19 = vpack.c.bf16 %v2875_v10, %v2874_v11  ;;  %v671_v56 = vld [vmem:[#allocation3 + $0x90] sm:$0xff] }
  0xe5   : > { %v2897_v59 = vsel %vm990_vm12, 1.0, %v3570_v24  ;;  %v2896_v60 = vsel %vm989_vm13, 1.0, %v3570_v24  ;;  %1598 = vmatprep.mubr.bf16.mxu1 %v3569_v13 }
  0xe6   : > { %v1085_v61 = vpack.c.bf16 %v2897_v59, %v2896_v60 }
  0xe7   : > { %v3967_v0 = vpop.permute.xlu1 %737  ;;  %v3969_v1 = vpop.permute.xlu0 %734 }
  0xe8   : > { %3158 = vmatprep.mubr.msk.bf16.mxu0 %vm1477_vm3, %v1085_v61  ;;  %vm798_vm13 = vcmp.eq.s32.totalorder %v670_v43, %v3967_v0  ;;  %vm797_vm14 = vcmp.eq.s32.totalorder %v669_v44, %v3969_v1 }
  0xe9   : > { %v2881_v51 = vsel %vm798_vm13, 1.0, %v3570_v24  ;;  %v2880_v52 = vsel %vm797_vm14, 1.0, %v3570_v24 }
  0xea   : > { %v885_v59 = vpack.c.bf16 %v2881_v51, %v2880_v52 }
  0xeb   : > { %v904_v5 = vpop.permute.xlu1 %903  ;;  %v901_v6 = vpop.permute.xlu0 %900 }
  0xec   : > { %vm992_vm0 = vcmp.eq.s32.totalorder %v3915_v26, %v904_v5  ;;  %vm991_vm1 = vcmp.eq.s32.totalorder %v3918_v29, %v901_v6  ;;  %2965 = vmatmul.mubr.msk.bf16.gmra.mxu1 %vm1477_vm3, %v881_v4  ;;  %v4012_v29 = vld [vmem:[#allocation3 + $0x70] sm:$0xff]  ;;  %v673_v4 = vld [vmem:[#allocation3 + $0xa0] sm:$0xff] }
  0xed   : > { %v2899_v7 = vsel %vm992_vm0, 1.0, %v3570_v24  ;;  %v2898_v8 = vsel %vm991_vm1, 1.0, %v3570_v24  ;;  %1608 = vmatprep.mubr.bf16.mxu1 %v3569_v13  ;;  %vm795_vm10 = vcmp.eq.s32.totalorder %v4012_v29, %v3952_v53 }
  0xee   : > { %v1086_v9 = vpack.c.bf16 %v2899_v7, %v2898_v8  ;;  %v2878_v40 = vsel %vm795_vm10, 1.0, %v3570_v24 }
  0xef   : > { %v910_v12 = vpop.permute.xlu1 %909  ;;  %v907_v14 = vpop.permute.xlu0 %906 }
  0xf0   : > { %vm994_vm2 = vcmp.eq.s32.totalorder %v3926_v36, %v910_v12  ;;  %vm993_vm4 = vcmp.eq.s32.totalorder %v3928_v37, %v907_v14  ;;  %3159 = vmatmul.mubr.msk.bf16.vlgmr.msra.gmra.mxu0 %vm1477_vm3, %v1086_v9 }
  0xf1   : > { %v2901_v17 = vsel %vm994_vm2, 1.0, %v3570_v24  ;;  %v2900_v18 = vsel %vm993_vm4, 1.0, %v3570_v24 }
  0xf2   : > { %v1087_v20 = vpack.c.bf16 %v2901_v17, %v2900_v18 }
  0xf3   : > { %v3995_v21 = vpop.permute.xlu1 %743  ;;  %v3997_v22 = vpop.permute.xlu0 %740 }
  0xf4   : > { %2966 = vmatmul.mubr.msk.bf16.gmra.mxu1 %vm1477_vm3, %v882_v19  ;;  %3162 = vmatprep.mubr.msk.bf16.mxu0 %vm1477_vm3, %v1087_v20  ;;  %vm799_vm5 = vcmp.eq.s32.totalorder %v671_v56, %v3997_v22  ;;  %v676_v19 = vld [vmem:[#allocation3 + $0xb8] sm:$0xff]  ;;  %v675_v20 = vld [vmem:[#allocation3 + $0xb0] sm:$0xff] }
  0xf5   : > { %1618 = vmatprep.mubr.bf16.mxu1 %v3569_v13  ;;  %v2882_v0 = vsel %vm799_vm5, 1.0, %v3570_v24 }
  0xf7   : > { %v916_v26 = vpop.permute.xlu1 %915  ;;  %v913_v27 = vpop.permute.xlu0 %912 }
  0xf8   : > { %vm996_vm7 = vcmp.eq.s32.totalorder %v3936_v45, %v916_v26  ;;  %vm995_vm8 = vcmp.eq.s32.totalorder %v3938_v46, %v913_v27  ;;  %v884_v45 = vpack.c.bf16 %v2879_v39, %v2878_v40 }
  0xf9   : > { %v2903_v30 = vsel %vm996_vm7, 1.0, %v3570_v24  ;;  %v2902_v31 = vsel %vm995_vm8, 1.0, %v3570_v24 }
  0xfa   : > { %v1088_v33 = vpack.c.bf16 %v2903_v30, %v2902_v31 }
  0xfb   : > { %v922_v34 = vpop.permute.xlu1 %921  ;;  %v919_v35 = vpop.permute.xlu0 %918 }
  0xfc   : > { %vm998_vm11 = vcmp.eq.s32.totalorder %v3954_v54, %v922_v34  ;;  %vm997_vm12 = vcmp.eq.s32.totalorder %v3956_v55, %v919_v35  ;;  %2967 = vmatmul.mubr.msk.bf16.gmra.mxu1 %vm1477_vm3, %v883_v32  ;;  %3163 = vmatmul.mubr.msk.bf16.gmra.mxu0 %vm1477_vm3, %v1088_v33  ;;  %v672_v55 = vld [vmem:[#allocation3 + $0x98] sm:$0xff]  ;;  %v678_v32 = vld [vmem:[#allocation3 + $0xc8] sm:$0xff]  ;;  %v677_v33 = vld [vmem:[#allocation3 + $0xc0] sm:$0xff] }
  0xfd   : > { %v2905_v36 = vsel %vm998_vm11, 1.0, %v3570_v24  ;;  %v2904_v37 = vsel %vm997_vm12, 1.0, %v3570_v24  ;;  %1628 = vmatprep.mubr.bf16.mxu1 %v3569_v13  ;;  %vm800_vm4 = vcmp.eq.s32.totalorder %v672_v55, %v3995_v21 }
  0xfe   : > { %v1089_v38 = vpack.c.bf16 %v2905_v36, %v2904_v37  ;;  %v2883_v63 = vsel %vm800_vm4, 1.0, %v3570_v24 }
  0xff   : > { %v750_v41 = vpop.permute.xlu1 %749  ;;  %v747_v42 = vpop.permute.xlu0 %746  ;;  %v886_v7 = vpack.c.bf16 %v2883_v63, %v2882_v0 }
 0x100   : > { %3166 = vmatprep.mubr.msk.bf16.mxu0 %vm1477_vm3, %v1089_v38  ;;  %vm801_vm9 = vcmp.eq.s32.totalorder %v673_v4, %v747_v42 }
 0x103   : > { %v928_v46 = vpop.permute.xlu1 %927  ;;  %v925_v47 = vpop.permute.xlu0 %924 }
 0x104   : > { %vm1000_vm15 = vcmp.eq.s32.totalorder %v3972_v2, %v928_v46  ;;  %vm999_vm0 = vcmp.eq.s32.totalorder %v3974_v3, %v925_v47  ;;  %2968 = vmatmul.mubr.msk.bf16.gmra.mxu1 %vm1477_vm3, %v884_v45  ;;  %v674_v3 = vld [vmem:[#allocation3 + $0xa8] sm:$0xff]  ;;  %v679_v45 = vld [vmem:[#allocation3 + $0xd0] sm:$0xff] }
 0x105   : > { %v2907_v48 = vsel %vm1000_vm15, 1.0, %v3570_v24  ;;  %v2906_v49 = vsel %vm999_vm0, 1.0, %v3570_v24  ;;  %1638 = vmatprep.mubr.bf16.mxu1 %v3569_v13  ;;  %vm802_vm8 = vcmp.eq.s32.totalorder %v674_v3, %v750_v41 }
 0x106   : > { %v1090_v50 = vpack.c.bf16 %v2907_v48, %v2906_v49 }
 0x107   : > { %v934_v53 = vpop.permute.xlu1 %933  ;;  %v931_v54 = vpop.permute.xlu0 %930 }
 0x108   : > { %vm1002_vm1 = vcmp.eq.s32.totalorder %v3989_v15, %v934_v53  ;;  %vm1001_vm2 = vcmp.eq.s32.totalorder %v3991_v16, %v931_v54  ;;  %3167 = vmatmul.mubr.msk.bf16.gmra.mxu0 %vm1477_vm3, %v1090_v50  ;;  %v2885_v15 = vsel %vm802_vm8, 1.0, %v3570_v24  ;;  %v2884_v16 = vsel %vm801_vm9, 1.0, %v3570_v24 }
 0x109   : > { %v2909_v57 = vsel %vm1002_vm1, 1.0, %v3570_v24  ;;  %v2908_v58 = vsel %vm1001_vm2, 1.0, %v3570_v24  ;;  %v887_v21 = vpack.c.bf16 %v2885_v15, %v2884_v16 }
 0x10a   : > { %v1091_v60 = vpack.c.bf16 %v2909_v57, %v2908_v58 }
 0x10b   : > { %v756_v61 = vpop.permute.xlu1 %755  ;;  %v753_v62 = vpop.permute.xlu0 %752 }
 0x10c   : > { %2969 = vmatmul.mubr.msk.bf16.gmra.mxu1 %vm1477_vm3, %v885_v59  ;;  %3170 = vmatprep.mubr.msk.bf16.mxu0 %vm1477_vm3, %v1091_v60  ;;  %vm804_vm12 = vcmp.eq.s32.totalorder %v676_v19, %v756_v61  ;;  %vm803_vm13 = vcmp.eq.s32.totalorder %v675_v20, %v753_v62  ;;  %v682_v59 = vld [vmem:[#allocation3 + $0xe8] sm:$0xff]  ;;  %v681_v60 = vld [vmem:[#allocation3 + $0xe0] sm:$0xff] }
 0x10d   : > { %1648 = vmatprep.mubr.bf16.mxu1 %v3569_v13 }
 0x10f   : > { %v940_v1 = vpop.permute.xlu1 %939  ;;  %v937_v2 = vpop.permute.xlu0 %936 }
 0x110   : > { %vm1004_vm6 = vcmp.eq.s32.totalorder %v4008_v28, %v940_v1  ;;  %vm1003_vm7 = vcmp.eq.s32.totalorder %v4012_v29, %v937_v2  ;;  %v2887_v28 = vsel %vm804_vm12, 1.0, %v3570_v24  ;;  %v2886_v29 = vsel %vm803_vm13, 1.0, %v3570_v24 }
 0x111   : > { %v2911_v5 = vsel %vm1004_vm6, 1.0, %v3570_v24  ;;  %v2910_v6 = vsel %vm1003_vm7, 1.0, %v3570_v24  ;;  %v888_v36 = vpack.c.bf16 %v2887_v28, %v2886_v29 }
 0x112   : > { %v1092_v8 = vpack.c.bf16 %v2911_v5, %v2910_v6 }
 0x113   : > { %v946_v9 = vpop.permute.xlu1 %945  ;;  %v943_v10 = vpop.permute.xlu0 %942 }
 0x114   : > { %vm1006_vm10 = vcmp.eq.s32.totalorder %v670_v43, %v946_v9  ;;  %vm1005_vm11 = vcmp.eq.s32.totalorder %v669_v44, %v943_v10  ;;  %2970 = vmatmul.mubr.msk.bf16.gmra.mxu1 %vm1477_vm3, %v886_v7  ;;  %3171 = vmatmul.mubr.msk.bf16.gmra.mxu0 %vm1477_vm3, %v1092_v8  ;;  %v680_v44 = vld [vmem:[#allocation3 + $0xd8] sm:$0xff] }
 0x115   : > { %v2913_v11 = vsel %vm1006_vm10, 1.0, %v3570_v24  ;;  %v2912_v12 = vsel %vm1005_vm11, 1.0, %v3570_v24  ;;  %1658 = vmatprep.mubr.bf16.mxu1 %v3569_v13 }
 0x116   : > { %v1093_v14 = vpack.c.bf16 %v2913_v11, %v2912_v12  ;;  %v684_v11 = vld [vmem:[#allocation3 + $0xf8] sm:$0xff]  ;;  %v683_v12 = vld [vmem:[#allocation3 + $0xf0] sm:$0xff] }
 0x117   : > { %v762_v17 = vpop.permute.xlu1 %761  ;;  %v759_v18 = vpop.permute.xlu0 %758 }
 0x118   : > { %3174 = vmatprep.mubr.msk.bf16.mxu0 %vm1477_vm3, %v1093_v14  ;;  %vm806_vm2 = vcmp.eq.s32.totalorder %v678_v32, %v762_v17  ;;  %vm805_vm4 = vcmp.eq.s32.totalorder %v677_v33, %v759_v18 }
 0x119   : > { %v2889_v40 = vsel %vm806_vm2, 1.0, %v3570_v24  ;;  %v2888_v41 = vsel %vm805_vm4, 1.0, %v3570_v24 }
 0x11a   : > { %v889_v48 = vpack.c.bf16 %v2889_v40, %v2888_v41 }
 0x11b   : > { %v952_v22 = vpop.permute.xlu1 %951  ;;  %v949_v23 = vpop.permute.xlu0 %948 }
 0x11c   : > { %vm1008_vm14 = vcmp.eq.s32.totalorder %v672_v55, %v952_v22  ;;  %vm1007_vm15 = vcmp.eq.s32.totalorder %v671_v56, %v949_v23  ;;  %2971 = vmatmul.mubr.msk.bf16.gmra.mxu1 %vm1477_vm3, %v887_v21 }
 0x11d   : > { %v2915_v25 = vsel %vm1008_vm14, 1.0, %v3570_v24  ;;  %v2914_v26 = vsel %vm1007_vm15, 1.0, %v3570_v24  ;;  %1668 = vmatprep.mubr.bf16.mxu1 %v3569_v13 }
 0x11e   : > { %v1094_v27 = vpack.c.bf16 %v2915_v25, %v2914_v26 }
 0x11f   : > { %v958_v30 = vpop.permute.xlu1 %957  ;;  %v955_v31 = vpop.permute.xlu0 %954 }
 0x120   : > { %vm1010_vm0 = vcmp.eq.s32.totalorder %v674_v3, %v958_v30  ;;  %vm1009_vm1 = vcmp.eq.s32.totalorder %v673_v4, %v955_v31  ;;  %3175 = vmatmul.mubr.msk.bf16.gmra.mxu0 %vm1477_vm3, %v1094_v27 }
 0x121   : > { %v2917_v34 = vsel %vm1010_vm0, 1.0, %v3570_v24  ;;  %v2916_v35 = vsel %vm1009_vm1, 1.0, %v3570_v24 }
 0x122   : > { %v1095_v37 = vpack.c.bf16 %v2917_v34, %v2916_v35 }
 0x123   : > { %v768_v38 = vpop.permute.xlu1 %767  ;;  %v765_v39 = vpop.permute.xlu0 %764 }
 0x124   : > { %2972 = vmatmul.mubr.msk.bf16.gmra.mxu1 %vm1477_vm3, %v888_v36  ;;  %3178 = vmatprep.mubr.msk.bf16.mxu0 %vm1477_vm3, %v1095_v37  ;;  %vm808_vm7 = vcmp.eq.s32.totalorder %v680_v44, %v768_v38  ;;  %vm807_vm8 = vcmp.eq.s32.totalorder %v679_v45, %v765_v39 }
 0x125   : > { %1678 = vmatprep.mubr.bf16.mxu1 %v3569_v13  ;;  %v2891_v55 = vsel %vm808_vm7, 1.0, %v3570_v24  ;;  %v2890_v56 = vsel %vm807_vm8, 1.0, %v3570_v24 }
 0x126   : > { %v890_v61 = vpack.c.bf16 %v2891_v55, %v2890_v56 }
 0x127   : > { %v964_v42 = vpop.permute.xlu1 %963  ;;  %v961_v43 = vpop.permute.xlu0 %960 }
 0x128   : > { %vm1012_vm5 = vcmp.eq.s32.totalorder %v676_v19, %v964_v42  ;;  %vm1011_vm6 = vcmp.eq.s32.totalorder %v675_v20, %v961_v43 }
 0x129   : > { %v2919_v46 = vsel %vm1012_vm5, 1.0, %v3570_v24  ;;  %v2918_v47 = vsel %vm1011_vm6, 1.0, %v3570_v24  ;;  %v4092_v2 = vpop.f32.mrf.mxu0 }
 0x12a   : > { %v1096_v49 = vpack.c.bf16 %v2919_v46, %v2918_v47 }
 0x12b   : > { %v970_v50 = vpop.permute.xlu1 %969  ;;  %v967_v51 = vpop.permute.xlu0 %966 }
 0x12c   : > { %vm1014_vm9 = vcmp.eq.s32.totalorder %v678_v32, %v970_v50  ;;  %vm1013_vm10 = vcmp.eq.s32.totalorder %v677_v33, %v967_v51  ;;  %2973 = vmatmul.mubr.msk.bf16.gmra.mxu1 %vm1477_vm3, %v889_v48  ;;  %3179 = vmatmul.mubr.msk.bf16.gmra.mxu0 %vm1477_vm3, %v1096_v49  ;;  %v4097_v8 = vpop.f32.mrf.mxu0 }
 0x12d   : > { %v2921_v52 = vsel %vm1014_vm9, 1.0, %v3570_v24  ;;  %v2920_v53 = vsel %vm1013_vm10, 1.0, %v3570_v24  ;;  %1688 = vmatprep.mubr.bf16.mxu1 %v3569_v13 }
 0x12e   : > { %v1097_v54 = vpack.c.bf16 %v2921_v52, %v2920_v53  ;;  %v4101_v16 = vpop.f32.mrf.mxu0 }
 0x12f   : > { %v774_v57 = vpop.permute.xlu1 %773  ;;  %v771_v58 = vpop.permute.xlu0 %770 }
 0x130   : > { %3182 = vmatprep.mubr.msk.bf16.mxu0 %vm1477_vm3, %v1097_v54  ;;  %vm810_vm11 = vcmp.eq.s32.totalorder %v682_v59, %v774_v57  ;;  %vm809_vm12 = vcmp.eq.s32.totalorder %v681_v60, %v771_v58  ;;  %v4105_v19 = vpop.f32.mrf.mxu0 }
 0x131   : > { %v2893_v4 = vsel %vm810_vm11, 1.0, %v3570_v24  ;;  %v2892_v5 = vsel %vm809_vm12, 1.0, %v3570_v24 }
 0x132   : > { %v891_v14 = vpack.c.bf16 %v2893_v4, %v2892_v5  ;;  %v4108_v20 = vpop.f32.mrf.mxu0 }
 0x133   : > { %v976_v62 = vpop.permute.xlu1 %975  ;;  %v973_v63 = vpop.permute.xlu0 %972 }
 0x134   : > { %vm1016_vm13 = vcmp.eq.s32.totalorder %v680_v44, %v976_v62  ;;  %vm1015_vm14 = vcmp.eq.s32.totalorder %v679_v45, %v973_v63  ;;  %2974 = vmatmul.mubr.msk.bf16.gmra.mxu1 %vm1477_vm3, %v890_v61  ;;  %v4112_v26 = vpop.f32.mrf.mxu0  ;;  %v4153_v45 = vld [vmem:[%s4846_s8] ss:$0 sm:$0xff] }
 0x135   : > { %v2923_v0 = vsel %vm1016_vm13, 1.0, %v3570_v24  ;;  %v2922_v1 = vsel %vm1015_vm14, 1.0, %v3570_v24  ;;  %1698 = vmatprep.mubr.bf16.mxu1 %v3569_v13 }
 0x136   : > { %v1098_v3 = vpack.c.bf16 %v2923_v0, %v2922_v1  ;;  %v4116_v31 = vpop.f32.mrf.mxu0 }
 0x137   : > { %v982_v6 = vpop.permute.xlu1 %981  ;;  %v979_v7 = vpop.permute.xlu0 %978 }
 0x138   : > { %vm1018_vm15 = vcmp.eq.s32.totalorder %v682_v59, %v982_v6  ;;  %vm1017_vm0 = vcmp.eq.s32.totalorder %v681_v60, %v979_v7  ;;  %3183 = vmatmul.mubr.msk.bf16.gmra.mxu0 %vm1477_vm3, %v1098_v3 }
 0x139   : > { %v2925_v9 = vsel %vm1018_vm15, 1.0, %v3570_v24  ;;  %v2924_v10 = vsel %vm1017_vm0, 1.0, %v3570_v24 }
 0x13a   : > { %v1099_v15 = vpack.c.bf16 %v2925_v9, %v2924_v10 }
 0x13b   : > { %v780_v17 = vpop.permute.xlu1 %779  ;;  %v777_v18 = vpop.permute.xlu0 %776 }
 0x13c   : > { %vm812_vm1 = vcmp.eq.s32.totalorder %v684_v11, %v780_v17  ;;  %vm811_vm2 = vcmp.eq.s32.totalorder %v683_v12, %v777_v18  ;;  %2975 = vmatmul.mubr.msk.bf16.gmra.mxu1 %vm1477_vm3, %v891_v14  ;;  %3186 = vmatprep.mubr.msk.bf16.mxu0 %vm1477_vm3, %v1099_v15 }
 0x13d   : > { %1708 = vmatprep.mubr.bf16.mxu1 %v3569_v13  ;;  %v2895_v21 = vsel %vm812_vm1, 1.0, %v3570_v24  ;;  %v2894_v22 = vsel %vm811_vm2, 1.0, %v3570_v24  ;;  %v4120_v13 = vpop.f32.mrf.mxu0 }
 0x13e   : > { %v892_v29 = vpack.c.bf16 %v2895_v21, %v2894_v22 }
 0x13f   : > { %v988_v23 = vpop.permute.xlu1 %987  ;;  %v985_v25 = vpop.permute.xlu0 %984 }
 0x140   : > { %vm1020_vm4 = vcmp.eq.s32.totalorder %v684_v11, %v988_v23  ;;  %vm1019_vm5 = vcmp.eq.s32.totalorder %v683_v12, %v985_v25  ;;  %v4122_v32 = vpop.f32.mrf.mxu0 }
 0x141   : > { %v2927_v27 = vsel %vm1020_vm4, 1.0, %v3570_v24  ;;  %v2926_v28 = vsel %vm1019_vm5, 1.0, %v3570_v24 }
 0x142   : > { %v1100_v30 = vpack.c.bf16 %v2927_v27, %v2926_v28  ;;  %v4124_v33 = vpop.f32.mrf.mxu0 }
 0x144   : > { %2976 = vmatmul.mubr.msk.bf16.gmra.mxu1 %vm1477_vm3, %v892_v29  ;;  %3187 = vmatmul.mubr.msk.bf16.gmra.mxu0 %vm1477_vm3, %v1100_v30  ;;  %v4126_v34 = vpop.f32.mrf.mxu0  ;;  %v1311_v30 = vadd.f32 %v4092_v2, %v4153_v45 }
 0x146   : > { %v4128_v35 = vpop.f32.mrf.mxu0 }
 0x148   : > { %v4130_v36 = vpop.f32.mrf.mxu0 }
 0x14a   : > { %v4132_v24 = vpop.f32.mrf.mxu0 }
 0x14c   : > { %v4134_v37 = vpop.f32.mrf.mxu0 }
 0x14e   : > { %v4136_v38 = vpop.f32.mrf.mxu0 }
 0x150   : > { %v4138_v39 = vpop.f32.mrf.mxu0 }
 0x152   : > { %v4140_v40 = vpop.f32.mrf.mxu0 }
 0x154   : > { %v4142_v41 = vpop.f32.mrf.mxu0 }
 0x156   : > { %v4144_v42 = vpop.f32.mrf.mxu0 }
 0x158   : > { %v4146_v43 = vpop.f32.mrf.mxu0 }
 0x15a   : > { %v4148_v44 = vpop.f32.mrf.mxu0 }
 0x15c   : > { %v3141_v46 = vpop.f32.mrf.mxu0 }
 0x15d   : > { %v4156_v47 = vadd.f32 %v3141_v46, %v4153_v45 }
 0x15e   : > { %v1385_v48 = vpop.f32.mrf.mxu0 }
 0x15f   : > { %v4159_v49 = vadd.f32 %v4153_v45, %v1385_v48  ;;  %v4218_v48 = vld [vmem:[%s4848_s10] ss:$0 sm:$0xff] }
 0x160   : > { %v3144_v50 = vpop.f32.mrf.mxu0 }
 0x161   : > { %v4162_v51 = vadd.f32 %v3144_v50, %v4153_v45 }
 0x162   : > { %v1398_v52 = vpop.f32.mrf.mxu0 }
 0x163   : > { %v4165_v53 = vadd.f32 %v4153_v45, %v1398_v52 }
 0x164   : > { %v3145_v54 = vpop.f32.mrf.mxu0 }
 0x165   : > { %v4168_v55 = vadd.f32 %v3145_v54, %v4153_v45  ;;  %v1303_v54 = vadd.f32 %v4153_v45, %v4097_v8 }
 0x166   : > { %v1401_v56 = vpop.f32.mrf.mxu0 }
 0x167   : > { %4869 = vst [vmem:[#allocation17_spill] sm:$0xff] %v4168_v55  ;;  %v4171_v57 = vadd.f32 %v4153_v45, %v1401_v56 }
 0x168   : > { %v3148_v58 = vpop.f32.mrf.mxu0 }
 0x169   : > { %4870 = vst [vmem:[#allocation18_spill] sm:$0xff] %v4171_v57  ;;  %v4174_v59 = vadd.f32 %v3148_v58, %v4153_v45 }
 0x16a   : > { %v1414_v60 = vpop.f32.mrf.mxu0 }
 0x16b   : > { %4871 = vst [vmem:[#allocation19_spill] sm:$0xff] %v4174_v59  ;;  %v4177_v61 = vadd.f32 %v4153_v45, %v1414_v60  ;;  %v4227_v60 = vld [vmem:[%s4848_s10 + $0x1] ss:$0 sm:$0xff] }
 0x16c   : > { %v3149_v62 = vpop.f32.mrf.mxu0 }
 0x16d   : > { %4872 = vst [vmem:[#allocation20_spill] sm:$0xff] %v4177_v61  ;;  %v4180_v63 = vadd.f32 %v3149_v62, %v4153_v45 }
 0x16e   : > { %v1417_v0 = vpop.f32.mrf.mxu0 }
 0x16f   : > { %4873 = vst [vmem:[#allocation21_spill] sm:$0xff] %v4180_v63  ;;  %v4183_v1 = vadd.f32 %v4153_v45, %v1417_v0  ;;  %v1314_v63 = vadd.f32 %v4101_v16, %v4153_v45 }
 0x171   : > { %4874 = vst [vmem:[#allocation22_spill] sm:$0xff] %v4183_v1 }
 0x18c   : > { %v1560_v3 = vpop.f32.mrf.mxu1 }
 0x18e   : > { %v4185_v4 = vpop.f32.mrf.mxu1 }
 0x190   : > { %v1564_v5 = vpop.f32.mrf.mxu1 }
 0x192   : > { %v4187_v6 = vpop.f32.mrf.mxu1 }
 0x194   : > { %v1570_v7 = vpop.f32.mrf.mxu1 }
 0x196   : > { %v4189_v9 = vpop.f32.mrf.mxu1 }
 0x198   : > { %v1574_v10 = vpop.f32.mrf.mxu1 }
 0x19a   : > { %v4191_v11 = vpop.f32.mrf.mxu1 }
 0x19c   : > { %v4193_v12 = vpop.f32.mrf.mxu1 }
 0x19e   : > { %v4195_v14 = vpop.f32.mrf.mxu1 }
 0x1a0   : > { %v4197_v15 = vpop.f32.mrf.mxu1 }
 0x1a2   : > { %v4199_v17 = vpop.f32.mrf.mxu1 }
 0x1a4   : > { %v1590_v18 = vpop.f32.mrf.mxu1 }
 0x1a6   : > { %v4201_v21 = vpop.f32.mrf.mxu1 }
 0x1a8   : > { %v4203_v22 = vpop.f32.mrf.mxu1 }
 0x1aa   : > { %v4205_v23 = vpop.f32.mrf.mxu1 }
 0x1ac   : > { %v4207_v25 = vpop.f32.mrf.mxu1 }
 0x1ae   : > { %v4209_v27 = vpop.f32.mrf.mxu1 }
 0x1b0   : > { %v4211_v28 = vpop.f32.mrf.mxu1  ;;  %v3160_v29 = vpop.f32.mrf.mxu0 }
 0x1b1   : > { %v1962_v46 = vadd.f32 %v3160_v29, %v1570_v7 }
 0x1b2   : > { %v4220_v50 = vpop.f32.mrf.mxu1  ;;  %v1833_v52 = vpop.f32.mrf.mxu0 }
 0x1b3   : > { %v1994_v56 = vadd.f32 %v1962_v46, %v1311_v30  ;;  %v1960_v58 = vadd.f32 %v1833_v52, %v1560_v3  ;;  %v1306_v52 = vadd.f32 %v4153_v45, %v4105_v19 }
 0x1b4   : > { %v4229_v2 = vpop.f32.mrf.mxu1  ;;  %v3161_v62 = vpop.f32.mrf.mxu0 }
 0x1b5   : > { %v2999_v0 = vmul.f32 -1.442695, %v1994_v56  ;;  %v2408_v7 = vmul.f32 %v4218_v48, %v1994_v56  ;;  %v1992_v29 = vadd.f32 %v1960_v58, %v1303_v54  ;;  %v1963_v1 = vadd.f32 %v3161_v62, %v1574_v10 }
 0x1b6   : > { %v4234_v61 = vpop.f32.mrf.mxu1  ;;  %v1836_v8 = vpop.f32.mrf.mxu0 }
 0x1b7   : > { %3300 = vpow2.f32 %v2999_v0  ;;  %v2445_v3 = vadd.f32 %v4227_v60, %v2408_v7  ;;  %v2997_v30 = vmul.f32 -1.442695, %v1992_v29  ;;  %v2406_v46 = vmul.f32 %v4218_v48, %v1992_v29  ;;  %v3428_v29 = vld [vmem:[%s3710_s15 + $0x10] sm:$0xff] }
 0x1b8   : > { %v1995_v59 = vadd.f32 %v1963_v1, %v1314_v63  ;;  %v1961_v56 = vadd.f32 %v1836_v8, %v1564_v5  ;;  %v4240_v54 = vpop.f32.mrf.mxu1 }
 0x1b9   : > { %v2477_v10 = vmax.f32 %v2445_v3, 0.0  ;;  %3302 = vpow2.f32 %v2997_v30  ;;  %v2443_v16 = vadd.f32 %v4227_v60, %v2406_v46  ;;  %v1327_v3 = vadd.f32 %v4108_v20, %v4153_v45 }
 0x1ba   : > { %v3000_v58 = vmul.f32 -1.442695, %v1995_v59  ;;  %v2409_v62 = vmul.f32 %v4218_v48, %v1995_v59  ;;  %v1993_v0 = vadd.f32 %v1961_v56, %v1306_v52  ;;  %v4244_v7 = vpop.f32.mrf.mxu1  ;;  %v3429_v59 = vld [vmem:[%s3710_s15] sm:$0xff] }
 0x1bb   : > { %v2509_v57 = vadd.f32 %v3428_v29, %v2477_v10  ;;  %v2475_v55 = vmax.f32 %v2443_v16, 0.0 }
 0x1bc   : > { %3304 = vpow2.f32 %v3000_v58  ;;  %v2446_v19 = vadd.f32 %v4227_v60, %v2409_v62  ;;  %v2998_v63 = vmul.f32 -1.442695, %v1993_v0  ;;  %v2407_v1 = vmul.f32 %v4218_v48, %v1993_v0  ;;  %v4249_v5 = vpop.f32.mrf.mxu1  ;;  %v3164_v8 = vpop.f32.mrf.mxu0  ;;  %v3430_v0 = vld [vmem:[%s3710_s15 + $0x18] sm:$0xff] }
 0x1bd   : > { %2541 = vst [vmem:[%s3717_s11 + $0x10] sm:$0xff] %v2509_v57  ;;  %v2507_v30 = vadd.f32 %v3429_v59, %v2475_v55  ;;  %v1966_v46 = vadd.f32 %v3164_v8, %v1590_v18  ;;  %v1319_v58 = vadd.f32 %v4153_v45, %v4112_v26  ;;  %v1330_v62 = vadd.f32 %v4116_v31, %v4153_v45  ;;  %v3431_v59 = vld [vmem:[%s3710_s15 + $0x8] sm:$0xff] }
 0x1be   : > { %v2478_v52 = vmax.f32 %v2446_v19, 0.0  ;;  %3306 = vpow2.f32 %v2998_v63  ;;  %v2444_v56 = vadd.f32 %v4227_v60, %v2407_v1  ;;  %v4256_v10 = vpop.f32.mrf.mxu1  ;;  %v1849_v16 = vpop.f32.mrf.mxu0  ;;  %v1322_v55 = vadd.f32 %v4153_v45, %v4120_v13 }
 0x1bf   : > { %2539 = vst [vmem:[%s3717_s11] sm:$0xff] %v2507_v30  ;;  %v1998_v20 = vadd.f32 %v1966_v46, %v1327_v3  ;;  %v1964_v57 = vadd.f32 %v1849_v16, %v4193_v12  ;;  %v4268_v18 = vadd.f32 %v4122_v32, %v4153_v45  ;;  %v4277_v13 = vadd.f32 %v4153_v45, %v4124_v33 }
 0x1c0   : > { %v2510_v29 = vadd.f32 %v3430_v0, %v2478_v52  ;;  %v2476_v19 = vmax.f32 %v2444_v56, 0.0  ;;  %v4271_v26 = vpop.f32.mrf.mxu1  ;;  %v3165_v63 = vpop.f32.mrf.mxu0  ;;  %v4281_v32 = vadd.f32 %v4126_v34, %v4153_v45  ;;  %v4285_v3 = vadd.f32 %v4153_v45, %v4128_v35 }
 0x1c1   : > { %v3003_v31 = vmul.f32 -1.442695, %v1998_v20  ;;  %v2412_v1 = vmul.f32 %v4218_v48, %v1998_v20  ;;  %v1996_v8 = vadd.f32 %v1964_v57, %v1319_v58  ;;  %v1967_v12 = vadd.f32 %v3165_v63, %v4203_v22 }
 0x1c2   : > { %2542 = vst [vmem:[%s3717_s11 + $0x18] sm:$0xff] %v2510_v29  ;;  %v2508_v30 = vadd.f32 %v3431_v59, %v2476_v19  ;;  %v4289_v46 = vpop.f32.mrf.mxu1  ;;  %v1852_v52 = vpop.f32.mrf.mxu0  ;;  %v4295_v34 = vadd.f32 %v4130_v36, %v4153_v45  ;;  %v4299_v35 = vadd.f32 %v4153_v45, %v4132_v24  ;;  %v4308_v36 = vadd.f32 %v4134_v37, %v4153_v45 }
 0x1c3   : > { %3308 = vpow2.f32 %v3003_v31  ;;  %v2449_v22 = vadd.f32 %v4227_v60, %v2412_v1  ;;  %v3001_v56 = vmul.f32 -1.442695, %v1996_v8  ;;  %v2410_v33 = vmul.f32 %v4218_v48, %v1996_v8  ;;  %v3432_v8 = vld [vmem:[%s3710_s15 + $0x30] sm:$0xff] }
 0x1c4   : > { %v3301_v16 = vpop.eup %3300  ;;  %2540 = vst [vmem:[%s3717_s11 + $0x8] sm:$0xff] %v2508_v30  ;;  %v1999_v58 = vadd.f32 %v1967_v12, %v1330_v62  ;;  %v1965_v20 = vadd.f32 %v1852_v52, %v4197_v15  ;;  %v4303_v57 = vpop.f32.mrf.mxu1 }
 0x1c5   : > { %v2122_v0 = vadd.f32 1.0, %v3301_v16  ;;  %v2481_v29 = vmax.f32 %v2449_v22, 0.0  ;;  %3310 = vpow2.f32 %v3001_v56  ;;  %v2447_v19 = vadd.f32 %v4227_v60, %v2410_v33  ;;  %v3433_v16 = vld [vmem:[%s3710_s15 + $0x20] sm:$0xff] }
 0x1c6   : > { %v3303_v63 = vpop.eup %3302  ;;  %v3004_v31 = vmul.f32 -1.442695, %v1999_v58  ;;  %v2413_v24 = vmul.f32 %v4218_v48, %v1999_v58  ;;  %v1997_v1 = vadd.f32 %v1965_v20, %v1322_v55  ;;  %v4311_v62 = vpop.f32.mrf.mxu1  ;;  %v4320_v55 = vadd.f32 %v4153_v45, %v4136_v38 }
 0x1c7   : > { %3312 = vrcp.f32 %v2122_v0  ;;  %v2120_v15 = vadd.f32 1.0, %v3303_v63  ;;  %v2513_v12 = vadd.f32 %v3432_v8, %v2481_v29  ;;  %v2479_v59 = vmax.f32 %v2447_v19, 0.0 }
 0x1c8   : > { %3314 = vpow2.f32 %v3004_v31  ;;  %v2450_v30 = vadd.f32 %v4227_v60, %v2413_v24  ;;  %v3002_v52 = vmul.f32 -1.442695, %v1997_v1  ;;  %v2411_v37 = vmul.f32 %v4218_v48, %v1997_v1  ;;  %v4316_v22 = vpop.f32.mrf.mxu1  ;;  %v3168_v56 = vpop.f32.mrf.mxu0 }
 0x1c9   : > { %v3305_v33 = vpop.eup %3304  ;;  %3316 = vrcp.f32 %v2120_v15  ;;  %2545 = vst [vmem:[%s3717_s11 + $0x30] sm:$0xff] %v2513_v12  ;;  %v2511_v58 = vadd.f32 %v3433_v16, %v2479_v59  ;;  %v1970_v20 = vadd.f32 %v3168_v56, %v4229_v2  ;;  %v4330_v38 = vadd.f32 %v4138_v39, %v4153_v45  ;;  %v3434_v12 = vld [vmem:[%s3710_s15 + $0x38] sm:$0xff]  ;;  %v3435_v16 = vld [vmem:[%s3710_s15 + $0x28] sm:$0xff] }
 0x1ca   : > { %v2123_v0 = vadd.f32 1.0, %v3305_v33  ;;  %v2482_v29 = vmax.f32 %v2450_v30, 0.0  ;;  %3318 = vpow2.f32 %v3002_v52  ;;  %v2448_v19 = vadd.f32 %v4227_v60, %v2411_v37  ;;  %v4326_v63 = vpop.f32.mrf.mxu1  ;;  %v1865_v31 = vpop.f32.mrf.mxu0 }
 0x1cb   : > { %v3307_v24 = vpop.eup %3306  ;;  %v4334_v1 = vadd.f32 %v4153_v45, %v4140_v40  ;;  %2543 = vst [vmem:[%s3717_s11 + $0x20] sm:$0xff] %v2511_v58  ;;  %v2002_v2 = vadd.f32 %v1970_v20, %v4268_v18  ;;  %v1968_v15 = vadd.f32 %v1865_v31, %v4207_v25  ;;  %v4347_v25 = vadd.f32 %v4142_v41, %v4153_v45 }
 0x1cc   : > { %3320 = vrcp.f32 %v2123_v0  ;;  %v2121_v8 = vadd.f32 1.0, %v3307_v24  ;;  %v2514_v59 = vadd.f32 %v3434_v12, %v2482_v29  ;;  %v2480_v30 = vmax.f32 %v2448_v19, 0.0  ;;  %v4340_v52 = vpop.f32.mrf.mxu1  ;;  %v3169_v39 = vpop.f32.mrf.mxu0 }
 0x1cd   : > { %v3007_v37 = vmul.f32 -1.442695, %v2002_v2  ;;  %v2416_v56 = vmul.f32 %v4218_v48, %v2002_v2  ;;  %v2000_v40 = vadd.f32 %v1968_v15, %v4277_v13  ;;  %v1971_v33 = vadd.f32 %v3169_v39, %v4240_v54 }
 0x1ce   : > { %v4351_v18 = vadd.f32 %v4153_v45, %v4144_v42  ;;  %3322 = vrcp.f32 %v2121_v8  ;;  %2546 = vst [vmem:[%s3717_s11 + $0x38] sm:$0xff] %v2514_v59  ;;  %v2512_v58 = vadd.f32 %v3435_v16, %v2480_v30  ;;  %v4355_v20 = vpop.f32.mrf.mxu1  ;;  %v1868_v0 = vpop.f32.mrf.mxu0  ;;  %v4361_v41 = vadd.f32 %v4146_v43, %v4153_v45 }
 0x1cf   : > { %3324 = vpow2.f32 %v3007_v37  ;;  %v2453_v13 = vadd.f32 %v4227_v60, %v2416_v56  ;;  %v3005_v54 = vmul.f32 -1.442695, %v2000_v40  ;;  %v2414_v29 = vmul.f32 %v4218_v48, %v2000_v40 }
 0x1d0   : > { %v3309_v19 = vpop.eup %3308  ;;  %v4365_v42 = vadd.f32 %v4153_v45, %v4148_v44  ;;  %2544 = vst [vmem:[%s3717_s11 + $0x28] sm:$0xff] %v2512_v58  ;;  %v2003_v31 = vadd.f32 %v1971_v33, %v4281_v32  ;;  %v1969_v24 = vadd.f32 %v1868_v0, %v4211_v28  ;;  %v4370_v2 = vpop.f32.mrf.mxu1  ;;  %v1117_v39 = vlaneseq  ;;  %v3436_v32 = vld [vmem:[%s3710_s15 + $0x50] sm:$0xff] }
 0x1d1   : > { %v2126_v15 = vadd.f32 1.0, %v3309_v19  ;;  %v2485_v8 = vmax.f32 %v2453_v13, 0.0  ;;  %3326 = vpow2.f32 %v3005_v54  ;;  %v2451_v12 = vadd.f32 %v4227_v60, %v2414_v29  ;;  %v3437_v54 = vld [vmem:[%s3710_s15 + $0x40] sm:$0xff] }
 0x1d2   : > { %v3311_v59 = vpop.eup %3310  ;;  %v3008_v43 = vmul.f32 -1.442695, %v2003_v31  ;;  %v2417_v30 = vmul.f32 %v4218_v48, %v2003_v31  ;;  %v2001_v44 = vadd.f32 %v1969_v24, %v4285_v3  ;;  %v4375_v45 = vpop.f32.mrf.mxu1 }
 0x1d3   : > { %3328 = vrcp.f32 %v2126_v15  ;;  %v2124_v28 = vadd.f32 1.0, %v3311_v59  ;;  %v2517_v37 = vadd.f32 %v3436_v32, %v2485_v8  ;;  %v2483_v56 = vmax.f32 %v2451_v12, 0.0 }
 0x1d4   : > { %v3313_v40 = vpop.eup %3312  ;;  %3330 = vpow2.f32 %v3008_v43  ;;  %v2454_v33 = vadd.f32 %v4227_v60, %v2417_v30  ;;  %v3006_v16 = vmul.f32 -1.442695, %v2001_v44  ;;  %v2415_v58 = vmul.f32 %v4218_v48, %v2001_v44  ;;  %v4380_v0 = vpop.f32.mrf.mxu1 }
 0x1d5   : > { %v3172_v3 = vpop.f32.mrf.mxu0  ;;  %v3315_v13 = vpop.eup %3314  ;;  %3332 = vrcp.f32 %v2124_v28  ;;  %2549 = vst [vmem:[%s3717_s11 + $0x50] sm:$0xff] %v2517_v37  ;;  %v2515_v29 = vadd.f32 %v3437_v54, %v2483_v56  ;;  %v2218_v31 = vmul.f32 %v3313_v40, %v4189_v9  ;;  %v4395_v9 = vshrl.u32 %v1117_v39, 7  ;;  %v3438_v37 = vld [vmem:[%s3710_s15 + $0x58] sm:$0xff]  ;;  %v3439_v39 = vld [vmem:[%s3710_s15 + $0x48] sm:$0xff] }
 0x1d6   : > { %v1974_v19 = vadd.f32 %v3172_v3, %v4303_v57  ;;  %v3317_v24 = vpop.eup %3316  ;;  %v2127_v15 = vadd.f32 1.0, %v3315_v13  ;;  %v2486_v8 = vmax.f32 %v2454_v33, 0.0  ;;  %3334 = vpow2.f32 %v3006_v16  ;;  %v4387_v59 = vpop.f32.mrf.mxu1 }
 0x1d7   : > { %v2452_v12 = vadd.f32 %v4227_v60, %v2415_v58  ;;  %v1881_v43 = vpop.f32.mrf.mxu0  ;;  %v3319_v30 = vpop.eup %3318  ;;  %2547 = vst [vmem:[%s3717_s11 + $0x40] sm:$0xff] %v2515_v29  ;;  %v4393_v57 = vmul.f32 %v3317_v24, %v4185_v4 }
 0x1d8   : > { %v2006_v44 = vadd.f32 %v1974_v19, %v4295_v34  ;;  %v1972_v28 = vadd.f32 %v1881_v43, %v4249_v5  ;;  %3336 = vrcp.f32 %v2127_v15  ;;  %v2125_v32 = vadd.f32 1.0, %v3319_v30  ;;  %v4398_v16 = vpop.f32.mrf.mxu1 }
 0x1d9   : > { %v2518_v56 = vadd.f32 %v3438_v37, %v2486_v8  ;;  %v2484_v33 = vmax.f32 %v2452_v12, 0.0  ;;  %v3173_v58 = vpop.f32.mrf.mxu0  ;;  %v3321_v3 = vpop.eup %3320 }
 0x1da   : > { %v3011_v13 = vmul.f32 -1.442695, %v2006_v44  ;;  %v2420_v34 = vmul.f32 %v4218_v48, %v2006_v44  ;;  %v2004_v5 = vadd.f32 %v1972_v28, %v4299_v35  ;;  %v1975_v4 = vadd.f32 %v3173_v58, %v4316_v22  ;;  %v4405_v29 = vpop.f32.mrf.mxu1 }
 0x1db   : > { %3338 = vrcp.f32 %v2125_v32  ;;  %2550 = vst [vmem:[%s3717_s11 + $0x58] sm:$0xff] %v2518_v56  ;;  %v2516_v54 = vadd.f32 %v3439_v39, %v2484_v33  ;;  %v1884_v19 = vpop.f32.mrf.mxu0  ;;  %v4407_v15 = vpack.c.bf16 %v3321_v3, %v3313_v40  ;;  %v2219_v8 = vmul.f32 %v3321_v3, %v4191_v11  ;;  %v3323_v12 = vpop.eup %3322 }
 0x1dc   : > { %3340 = vpow2.f32 %v3011_v13  ;;  %v2457_v43 = vadd.f32 %v4227_v60, %v2420_v34  ;;  %v3009_v30 = vmul.f32 -1.442695, %v2004_v5  ;;  %v2418_v35 = vmul.f32 %v4218_v48, %v2004_v5  ;;  %v3325_v44 = vpop.eup %3324  ;;  %v4415_v32 = vpop.f32.mrf.mxu1 }
 0x1dd   : > { %2548 = vst [vmem:[%s3717_s11 + $0x48] sm:$0xff] %v2516_v54  ;;  %v2007_v22 = vadd.f32 %v1975_v4, %v4308_v36  ;;  %v1973_v28 = vadd.f32 %v1884_v19, %v4271_v26  ;;  %v4417_v40 = vpack.c.bf16 %v2219_v8, %v2218_v31  ;;  %v4419_v37 = vpack.c.bf16 %v3323_v12, %v3317_v24  ;;  %v3440_v24 = vld [vmem:[%s3710_s15 + $0x70] sm:$0xff] }
 0x1de   : > { %v2130_v11 = vadd.f32 1.0, %v3325_v44  ;;  %v2489_v56 = vmax.f32 %v2457_v43, 0.0  ;;  %3342 = vpow2.f32 %v3009_v30  ;;  %v2455_v33 = vadd.f32 %v4227_v60, %v2418_v35  ;;  %v3327_v58 = vpop.eup %3326  ;;  %v4424_v34 = vpop.f32.mrf.mxu1 }
 0x1df   : > { %v3012_v3 = vmul.f32 -1.442695, %v2007_v22  ;;  %v2421_v13 = vmul.f32 %v4218_v48, %v2007_v22  ;;  %v2005_v36 = vadd.f32 %v1973_v28, %v4320_v55  ;;  %v2217_v26 = vmul.f32 %v3323_v12, %v4187_v6  ;;  %v3441_v6 = vld [vmem:[%s3710_s15 + $0x60] sm:$0xff] }
 0x1e0   : > { %3344 = vrcp.f32 %v2130_v11  ;;  %v2128_v31 = vadd.f32 1.0, %v3327_v58  ;;  %v2521_v5 = vadd.f32 %v3440_v24, %v2489_v56  ;;  %v2487_v4 = vmax.f32 %v2455_v33, 0.0  ;;  %v3329_v39 = vpop.eup %3328  ;;  %v4430_v43 = vpop.f32.mrf.mxu1  ;;  %v3442_v24 = vld [vmem:[%s3710_s15 + $0x78] sm:$0xff] }
 0x1e1   : > { %3346 = vpow2.f32 %v3012_v3  ;;  %v2458_v54 = vadd.f32 %v4227_v60, %v2421_v13  ;;  %v3010_v19 = vmul.f32 -1.442695, %v2005_v36  ;;  %v2419_v8 = vmul.f32 %v4218_v48, %v2005_v36  ;;  %v3176_v55 = vpop.f32.mrf.mxu0  ;;  %v3331_v30 = vpop.eup %3330 }
 0x1e2   : > { %3348 = vrcp.f32 %v2128_v31  ;;  %2553 = vst [vmem:[%s3717_s11 + $0x70] sm:$0xff] %v2521_v5  ;;  %v2519_v12 = vadd.f32 %v3441_v6, %v2487_v4  ;;  %v1978_v35 = vadd.f32 %v3176_v55, %v4380_v0  ;;  %v2222_v44 = vmul.f32 %v3329_v39, %v4201_v21  ;;  %v3333_v22 = vpop.eup %3332  ;;  %v4437_v33 = vpop.f32.mrf.mxu1 }
 0x1e3   : > { %v2131_v28 = vadd.f32 1.0, %v3331_v30  ;;  %v2490_v11 = vmax.f32 %v2458_v54, 0.0  ;;  %3350 = vpow2.f32 %v3010_v19  ;;  %v2456_v56 = vadd.f32 %v4227_v60, %v2419_v8  ;;  %v1897_v58 = vpop.f32.mrf.mxu0  ;;  %v3335_v3 = vpop.eup %3334 }
 0x1e4   : > { %2551 = vst [vmem:[%s3717_s11 + $0x60] sm:$0xff] %v2519_v12  ;;  %v2010_v13 = vadd.f32 %v1978_v35, %v4330_v38  ;;  %v1976_v36 = vadd.f32 %v1897_v58, %v4340_v52  ;;  %v4443_v0 = vmul.f32 %v3333_v22, %v4195_v14  ;;  %v4446_v21 = vpack.c.bf16 %v2217_v26, %v4393_v57  ;;  %v1670_v54 = vpop.f32.mrf.mxu1  ;;  %v3443_v57 = vld [vmem:[%s3710_s15 + $0x68] sm:$0xff] }
 0x1e5   : > { %3352 = vrcp.f32 %v2131_v28  ;;  %v2129_v31 = vadd.f32 1.0, %v3335_v3  ;;  %v2522_v5 = vadd.f32 %v3442_v24, %v2490_v11  ;;  %v2488_v4 = vmax.f32 %v2456_v56, 0.0  ;;  %v3177_v19 = vpop.f32.mrf.mxu0  ;;  %v3337_v8 = vpop.eup %3336 }
 0x1e6   : > { %v3015_v55 = vmul.f32 -1.442695, %v2010_v13  ;;  %v2424_v38 = vmul.f32 %v4218_v48, %v2010_v13  ;;  %v2008_v52 = vadd.f32 %v1976_v36, %v4334_v1  ;;  %v1979_v14 = vadd.f32 %v3177_v19, %v4398_v16  ;;  %v4454_v30 = vpop.f32.mrf.mxu1 }
 0x1e7   : > { %3354 = vrcp.f32 %v2129_v31  ;;  %2554 = vst [vmem:[%s3717_s11 + $0x78] sm:$0xff] %v2522_v5  ;;  %v2520_v26 = vadd.f32 %v3443_v57, %v2488_v4  ;;  %v1900_v6 = vpop.f32.mrf.mxu0  ;;  %v4456_v12 = vpack.c.bf16 %v3337_v8, %v3329_v39  ;;  %v2223_v35 = vmul.f32 %v3337_v8, %v4205_v23 }
 0x1e8   : > { %v3339_v28 = vpop.eup %3338  ;;  %3356 = vpow2.f32 %v3015_v55  ;;  %v2461_v11 = vadd.f32 %v4227_v60, %v2424_v38  ;;  %v3013_v56 = vmul.f32 -1.442695, %v2008_v52  ;;  %v2422_v1 = vmul.f32 %v4218_v48, %v2008_v52  ;;  %v1674_v13 = vpop.f32.mrf.mxu1 }
 0x1e9   : > { %v3341_v58 = vpop.eup %3340  ;;  %2552 = vst [vmem:[%s3717_s11 + $0x68] sm:$0xff] %v2520_v26  ;;  %v2011_v16 = vadd.f32 %v1979_v14, %v4347_v25  ;;  %v1977_v3 = vadd.f32 %v1900_v6, %v4370_v2  ;;  %v4464_v36 = vpack.c.bf16 %v2223_v35, %v2222_v44  ;;  %v4466_v39 = vpack.c.bf16 %v3339_v28, %v3333_v22  ;;  %v3444_v22 = vld [vmem:[%s3710_s15 + $0x90] sm:$0xff] }
 0x1ea   : > { %v2134_v23 = vadd.f32 1.0, %v3341_v58  ;;  %v2493_v31 = vmax.f32 %v2461_v11, 0.0  ;;  %3358 = vpow2.f32 %v3013_v56  ;;  %v2459_v24 = vadd.f32 %v4227_v60, %v2422_v1  ;;  %v4471_v25 = vpop.f32.mrf.mxu1 }
 0x1eb   : > { %v3343_v5 = vpop.eup %3342  ;;  %v3016_v4 = vmul.f32 -1.442695, %v2011_v16  ;;  %v2425_v19 = vmul.f32 %v4218_v48, %v2011_v16  ;;  %v2009_v8 = vadd.f32 %v1977_v3, %v4351_v18  ;;  %v2221_v2 = vmul.f32 %v3339_v28, %v4199_v17  ;;  %v3445_v17 = vld [vmem:[%s3710_s15 + $0x80] sm:$0xff] }
 0x1ec   : > { %3360 = vrcp.f32 %v2134_v23  ;;  %v2132_v44 = vadd.f32 1.0, %v3343_v5  ;;  %v2525_v55 = vadd.f32 %v3444_v22, %v2493_v31  ;;  %v2491_v38 = vmax.f32 %v2459_v24, 0.0  ;;  %v4477_v6 = vpop.f32.mrf.mxu1  ;;  %v3180_v18 = vpop.f32.mrf.mxu0 }
 0x1ed   : > { %v3345_v52 = vpop.eup %3344  ;;  %3362 = vpow2.f32 %v3016_v4  ;;  %v2462_v14 = vadd.f32 %v4227_v60, %v2425_v19  ;;  %v3014_v57 = vmul.f32 -1.442695, %v2009_v8  ;;  %v2423_v26 = vmul.f32 %v4218_v48, %v2009_v8  ;;  %v3446_v8 = vld [vmem:[%s3710_s15 + $0x98] sm:$0xff] }
 0x1ee   : > { %v3347_v35 = vpop.eup %3346  ;;  %3364 = vrcp.f32 %v2132_v44  ;;  %2557 = vst [vmem:[%s3717_s11 + $0x90] sm:$0xff] %v2525_v55  ;;  %v2523_v28 = vadd.f32 %v3445_v17, %v2491_v38  ;;  %v1982_v11 = vadd.f32 %v3180_v18, %v1670_v54  ;;  %v2226_v56 = vmul.f32 %v3345_v52, %v4234_v61  ;;  %v4483_v23 = vpop.f32.mrf.mxu1 }
 0x1ef   : > { %v3349_v1 = vpop.eup %3348  ;;  %v2135_v58 = vadd.f32 1.0, %v3347_v35  ;;  %v2494_v16 = vmax.f32 %v2462_v14, 0.0  ;;  %3366 = vpow2.f32 %v3014_v57  ;;  %v2460_v3 = vadd.f32 %v4227_v60, %v2423_v26  ;;  %v1913_v31 = vpop.f32.mrf.mxu0 }
 0x1f0   : > { %v3351_v24 = vpop.eup %3350  ;;  %2555 = vst [vmem:[%s3717_s11 + $0x80] sm:$0xff] %v2523_v28  ;;  %v2014_v5 = vadd.f32 %v1982_v11, %v4361_v41  ;;  %v1980_v4 = vadd.f32 %v1913_v31, %v4415_v32  ;;  %v4489_v54 = vmul.f32 %v3349_v1, %v4209_v27  ;;  %v4492_v61 = vpack.c.bf16 %v2221_v2, %v4443_v0  ;;  %v4495_v55 = vpop.f32.mrf.mxu1  ;;  %v3447_v0 = vld [vmem:[%s3710_s15 + $0x88] sm:$0xff] }
 0x1f1   : > { %3368 = vrcp.f32 %v2135_v58  ;;  %v2133_v19 = vadd.f32 1.0, %v3351_v24  ;;  %v2526_v44 = vadd.f32 %v3446_v8, %v2494_v16  ;;  %v2492_v22 = vmax.f32 %v2460_v3, 0.0  ;;  %v3181_v38 = vpop.f32.mrf.mxu0 }
 0x1f2   : > { %v3353_v14 = vpop.eup %3352  ;;  %v3019_v41 = vmul.f32 -1.442695, %v2014_v5  ;;  %v2428_v32 = vmul.f32 %v4218_v48, %v2014_v5  ;;  %v2012_v57 = vadd.f32 %v1980_v4, %v4365_v42  ;;  %v1983_v27 = vadd.f32 %v3181_v38, %v1674_v13  ;;  %v4501_v26 = vpop.f32.mrf.mxu1 }
 0x1f3   : > { %3370 = vrcp.f32 %v2133_v19  ;;  %2558 = vst [vmem:[%s3717_s11 + $0x98] sm:$0xff] %v2526_v44  ;;  %v2524_v2 = vadd.f32 %v3447_v0, %v2492_v22  ;;  %v1916_v18 = vpop.f32.mrf.mxu0  ;;  %v4503_v35 = vpack.c.bf16 %v3353_v14, %v3345_v52  ;;  %v2227_v17 = vmul.f32 %v3353_v14, %v4244_v7 }
 0x1f4   : > { %v3355_v28 = vpop.eup %3354  ;;  %3372 = vpow2.f32 %v3019_v41  ;;  %v2465_v11 = vadd.f32 %v4227_v60, %v2428_v32  ;;  %v3017_v58 = vmul.f32 -1.442695, %v2012_v57  ;;  %v2426_v42 = vmul.f32 %v4218_v48, %v2012_v57  ;;  %v1690_v31 = vpop.f32.mrf.mxu1 }
 0x1f5   : > { %v3357_v16 = vpop.eup %3356  ;;  %2556 = vst [vmem:[%s3717_s11 + $0x88] sm:$0xff] %v2524_v2  ;;  %v2015_v13 = vadd.f32 %v1983_v27, %v4156_v47  ;;  %v1981_v3 = vadd.f32 %v1916_v18, %v4430_v43  ;;  %v4511_v24 = vpack.c.bf16 %v2227_v17, %v2226_v56  ;;  %v4513_v52 = vpack.c.bf16 %v3355_v28, %v3349_v1  ;;  %v3448_v1 = vld [vmem:[%s3710_s15 + $0xb0] sm:$0xff] }
 0x1f6   : > { %v2138_v7 = vadd.f32 1.0, %v3357_v16  ;;  %v2497_v5 = vmax.f32 %v2465_v11, 0.0  ;;  %3374 = vpow2.f32 %v3017_v58  ;;  %v2463_v4 = vadd.f32 %v4227_v60, %v2426_v42  ;;  %v4518_v47 = vpop.f32.mrf.mxu1 }
 0x1f7   : > { %v3359_v19 = vpop.eup %3358  ;;  %v3020_v8 = vmul.f32 -1.442695, %v2015_v13  ;;  %v2429_v44 = vmul.f32 %v4218_v48, %v2015_v13  ;;  %v2013_v22 = vadd.f32 %v1981_v3, %v4159_v49  ;;  %v2225_v43 = vmul.f32 %v3355_v28, %v4220_v50  ;;  %v3449_v50 = vld [vmem:[%s3710_s15 + $0xa0] sm:$0xff] }
 0x1f8   : > { %3376 = vrcp.f32 %v2138_v7  ;;  %v2136_v56 = vadd.f32 1.0, %v3359_v19  ;;  %v2529_v38 = vadd.f32 %v3448_v1, %v2497_v5  ;;  %v2495_v14 = vmax.f32 %v2463_v4, 0.0  ;;  %v1694_v0 = vpop.f32.mrf.mxu1  ;;  %v3184_v49 = vpop.f32.mrf.mxu0 }
 0x1f9   : > { %v3361_v41 = vpop.eup %3360  ;;  %3378 = vpow2.f32 %v3020_v8  ;;  %v2466_v32 = vadd.f32 %v4227_v60, %v2429_v44  ;;  %v3018_v57 = vmul.f32 -1.442695, %v2013_v22  ;;  %v2427_v27 = vmul.f32 %v4218_v48, %v2013_v22  ;;  %v3450_v8 = vld [vmem:[%s3710_s15 + $0xb8] sm:$0xff] }
 0x1fa   : > { %v3363_v2 = vpop.eup %3362  ;;  %3380 = vrcp.f32 %v2136_v56  ;;  %2561 = vst [vmem:[%s3717_s11 + $0xb0] sm:$0xff] %v2529_v38  ;;  %v2527_v18 = vadd.f32 %v3449_v50, %v2495_v14  ;;  %v1986_v17 = vadd.f32 %v3184_v49, %v1690_v31  ;;  %v2230_v28 = vmul.f32 %v3361_v41, %v4311_v62  ;;  %v4528_v13 = vpop.f32.mrf.mxu1 }
 0x1fb   : > { %v3365_v11 = vpop.eup %3364  ;;  %v2139_v58 = vadd.f32 1.0, %v3363_v2  ;;  %v2498_v42 = vmax.f32 %v2466_v32, 0.0  ;;  %3382 = vpow2.f32 %v3018_v57  ;;  %v2464_v16 = vadd.f32 %v4227_v60, %v2427_v27  ;;  %v1929_v3 = vpop.f32.mrf.mxu0 }
 0x1fc   : > { %v3367_v7 = vpop.eup %3366  ;;  %2559 = vst [vmem:[%s3717_s11 + $0xa0] sm:$0xff] %v2527_v18  ;;  %v2018_v5 = vadd.f32 %v1986_v17, %v4162_v51  ;;  %v1984_v4 = vadd.f32 %v1929_v3, %v4477_v6  ;;  %v4534_v31 = vmul.f32 %v3365_v11, %v4256_v10  ;;  %v4537_v62 = vpack.c.bf16 %v2225_v43, %v4489_v54  ;;  %v4540_v56 = vpop.f32.mrf.mxu1  ;;  %v3451_v54 = vld [vmem:[%s3710_s15 + $0xa8] sm:$0xff] }
 0x1fd   : > { %3384 = vrcp.f32 %v2139_v58  ;;  %v2137_v19 = vadd.f32 1.0, %v3367_v7  ;;  %v2530_v44 = vadd.f32 %v3450_v8, %v2498_v42  ;;  %v2496_v22 = vmax.f32 %v2464_v16, 0.0  ;;  %v3185_v1 = vpop.f32.mrf.mxu0 }
 0x1fe   : > { %v3369_v38 = vpop.eup %3368  ;;  %v3023_v51 = vmul.f32 -1.442695, %v2018_v5  ;;  %v2432_v6 = vmul.f32 %v4218_v48, %v2018_v5  ;;  %v2016_v14 = vadd.f32 %v1984_v4, %v4165_v53  ;;  %v1987_v10 = vadd.f32 %v3185_v1, %v1694_v0  ;;  %v4546_v32 = vpop.f32.mrf.mxu1  ;;  %v4875_v0 = vld [vmem:[#allocation17_spill] sm:$0xff] }
 0x1ff   : > { %3386 = vrcp.f32 %v2137_v19  ;;  %2562 = vst [vmem:[%s3717_s11 + $0xb8] sm:$0xff] %v2530_v44  ;;  %v2528_v43 = vadd.f32 %v3451_v54, %v2496_v22  ;;  %v1932_v57 = vpop.f32.mrf.mxu0  ;;  %v2263_v27 = vpack.c.bf16 %v3369_v38, %v3361_v41  ;;  %v2231_v49 = vmul.f32 %v3369_v38, %v4326_v63  ;;  %v4876_v44 = vld [vmem:[#allocation18_spill] sm:$0xff]  ;;  %v3452_v38 = vld [vmem:[%s3710_s15 + $0xd0] sm:$0xff] }
 0x200   : > { %v3371_v2 = vpop.eup %3370  ;;  %3388 = vpow2.f32 %v3023_v51  ;;  %v2469_v50 = vadd.f32 %v4227_v60, %v2432_v6  ;;  %v3021_v18 = vmul.f32 -1.442695, %v2016_v14  ;;  %v2430_v17 = vmul.f32 %v4218_v48, %v2016_v14  ;;  %v4554_v16 = vpop.f32.mrf.mxu1 }
 0x201   : > { %v3373_v53 = vpop.eup %3372  ;;  %2560 = vst [vmem:[%s3717_s11 + $0xa8] sm:$0xff] %v2528_v43  ;;  %v2019_v58 = vadd.f32 %v1987_v10, %v4875_v0  ;;  %v1985_v42 = vadd.f32 %v1932_v57, %v4495_v55  ;;  %2296 = vmatprep.subr.bf16.mxu0 %v2263_v27  ;;  %3190 = vmatprep.subr.bf16.mxu1 %v2263_v27  ;;  %v1123_v63 = vsub.s32 1, %v4395_v9 }
 0x202   : > { %v2262_v41 = vpack.c.bf16 %v2231_v49, %v2230_v28  ;;  %v2142_v3 = vadd.f32 1.0, %v3373_v53  ;;  %v2501_v7 = vmax.f32 %v2469_v50, 0.0  ;;  %3390 = vpow2.f32 %v3021_v18  ;;  %v4560_v55 = vpop.f32.mrf.mxu1  ;;  %v3453_v49 = vld [vmem:[%s3710_s15 + $0xc0] sm:$0xff] }
 0x203   : > { %v2467_v5 = vadd.f32 %v4227_v60, %v2430_v17  ;;  %v3375_v4 = vpop.eup %3374  ;;  %v3024_v19 = vmul.f32 -1.442695, %v2019_v58  ;;  %v2433_v8 = vmul.f32 %v4218_v48, %v2019_v58  ;;  %v2017_v22 = vadd.f32 %v1985_v42, %v4876_v44  ;;  %v3454_v44 = vld [vmem:[%s3710_s15 + $0xd8] sm:$0xff] }
 0x204   : > { %2297 = vmatpush1.bf16.msra.mxu0 %v2262_v41  ;;  %3206 = vmatpush1.bf16.msra.mxu1 %v2262_v41  ;;  %v2261_v1 = vpack.c.bf16 %v3371_v2, %v3365_v11  ;;  %3392 = vrcp.f32 %v2142_v3  ;;  %v2140_v28 = vadd.f32 1.0, %v3375_v4  ;;  %v2533_v51 = vadd.f32 %v3452_v38, %v2501_v7  ;;  %v1710_v57 = vpop.f32.mrf.mxu1  ;;  %v3188_v27 = vpop.f32.mrf.mxu0 }
 0x205   : > { %v2499_v6 = vmax.f32 %v2467_v5, 0.0  ;;  %v3377_v14 = vpop.eup %3376  ;;  %3394 = vpow2.f32 %v3024_v19  ;;  %v2470_v10 = vadd.f32 %v4227_v60, %v2433_v8  ;;  %v3022_v54 = vmul.f32 -1.442695, %v2017_v22  ;;  %v4877_v5 = vld [vmem:[#allocation19_spill] sm:$0xff] }
 0x206   : > { %v2431_v43 = vmul.f32 %v4218_v48, %v2017_v22  ;;  %2298 = vmatprep.subr.bf16.mxu0 %v2261_v1  ;;  %3191 = vmatprep.subr.bf16.mxu1 %v2261_v1  ;;  %v3379_v11 = vpop.eup %3378  ;;  %3396 = vrcp.f32 %v2140_v28  ;;  %2565 = vst [vmem:[%s3717_s11 + $0xd0] sm:$0xff] %v2533_v51  ;;  %v1990_v18 = vadd.f32 %v3188_v27, %v1710_v57  ;;  %v4569_v41 = vpop.f32.mrf.mxu1 }
 0x207   : > { %v2531_v50 = vadd.f32 %v3453_v49, %v2499_v6  ;;  %v2229_v17 = vmul.f32 %v3371_v2, %v4289_v46  ;;  %v3381_v53 = vpop.eup %3380  ;;  %v2143_v0 = vadd.f32 1.0, %v3379_v11  ;;  %v2502_v58 = vmax.f32 %v2470_v10, 0.0  ;;  %v1945_v3 = vpop.f32.mrf.mxu0 }
 0x208   : > { %3398 = vpow2.f32 %v3022_v54  ;;  %v2468_v42 = vadd.f32 %v4227_v60, %v2431_v43  ;;  %v3383_v7 = vpop.eup %3382  ;;  %v2022_v4 = vadd.f32 %v1990_v18, %v4877_v5  ;;  %v1988_v8 = vadd.f32 %v1945_v3, %v4540_v56  ;;  %v1714_v28 = vpop.f32.mrf.mxu1 }
 0x209   : > { %2563 = vst [vmem:[%s3717_s11 + $0xc0] sm:$0xff] %v2531_v50  ;;  %v2260_v19 = vpack.c.bf16 %v2229_v17, %v4534_v31  ;;  %v2234_v46 = vmul.f32 %v3377_v14, %v4387_v59  ;;  %3400 = vrcp.f32 %v2143_v0  ;;  %v2141_v2 = vadd.f32 1.0, %v3383_v7  ;;  %v3189_v38 = vpop.f32.mrf.mxu0  ;;  %v4878_v31 = vld [vmem:[#allocation20_spill] sm:$0xff]  ;;  %v3455_v59 = vld [vmem:[%s3710_s15 + $0xc8] sm:$0xff] }
 0x20a   : > { %v2534_v22 = vadd.f32 %v3454_v44, %v2502_v58  ;;  %v2500_v1 = vmax.f32 %v2468_v42, 0.0  ;;  %v3385_v51 = vpop.eup %3384  ;;  %v3027_v6 = vmul.f32 -1.442695, %v2022_v4  ;;  %v2436_v10 = vmul.f32 %v4218_v48, %v2022_v4  ;;  %v4879_v58 = vld [vmem:[#allocation21_spill] sm:$0xff] }
 0x20b   : > { %2299 = vmatpush1.bf16.msra.mxu0 %v2260_v19  ;;  %3207 = vmatpush1.bf16.msra.mxu1 %v2260_v19  ;;  %v2020_v54 = vadd.f32 %v1988_v8, %v4878_v31  ;;  %v1991_v56 = vadd.f32 %v3189_v38, %v1714_v28  ;;  %3402 = vrcp.f32 %v2141_v2  ;;  %v1948_v57 = vpop.f32.mrf.mxu0  ;;  %v4583_v27 = vpack.c.bf16 %v3385_v51, %v3377_v14  ;;  %v4880_v8 = vld [vmem:[#allocation22_spill] sm:$0xff]  ;;  %v3457_v2 = vld [vmem:[%s3710_s15 + $0xf0] sm:$0xff]  ;;  %v3458_v28 = vld [vmem:[%s4848_s10 + $0x1] ss:$0 sm:$0xff] }
 0x20c   : > { %2566 = vst [vmem:[%s3717_s11 + $0xd8] sm:$0xff] %v2534_v22  ;;  %v2532_v43 = vadd.f32 %v3455_v59, %v2500_v1  ;;  %2300 = vmatprep.subr.bf16.mxu0 %v4503_v35  ;;  %3192 = vmatprep.subr.bf16.mxu1 %v4503_v35  ;;  %v2235_v11 = vmul.f32 %v3385_v51, %v4405_v29  ;;  %v3387_v49 = vpop.eup %3386  ;;  %3404 = vpow2.f32 %v3027_v6 }
 0x20d   : > { %v2473_v50 = vadd.f32 %v4227_v60, %v2436_v10  ;;  %v3025_v18 = vmul.f32 -1.442695, %v2020_v54  ;;  %v2434_v17 = vmul.f32 %v4218_v48, %v2020_v54  ;;  %v3389_v0 = vpop.eup %3388  ;;  %v2023_v42 = vadd.f32 %v1991_v56, %v4879_v58  ;;  %v4610_v10 = vld [vmem:[%s3715_s16] sm:$0x3] }
 0x20e   : > { %2564 = vst [vmem:[%s3717_s11 + $0xc8] sm:$0xff] %v2532_v43  ;;  %v1989_v3 = vadd.f32 %v1948_v57, %v4554_v16  ;;  %v4591_v7 = vpack.c.bf16 %v2235_v11, %v2234_v46  ;;  %v4593_v35 = vpack.c.bf16 %v3387_v49, %v3381_v53  ;;  %v2146_v14 = vadd.f32 1.0, %v3389_v0  ;;  %v3456_v16 = vld [vmem:[%s4848_s10] ss:$0 sm:$0xff]  ;;  %v1106_v11 = vld [vmem:[#allocation4 + $0x30] sm:$0xff] }
 0x20f   : > { %v2505_v29 = vmax.f32 %v2473_v50, 0.0  ;;  %3406 = vpow2.f32 %v3025_v18  ;;  %v2471_v5 = vadd.f32 %v4227_v60, %v2434_v17  ;;  %2301 = vmatpush1.bf16.msra.mxu0 %v4511_v24  ;;  %3208 = vmatpush1.bf16.msra.mxu1 %v4511_v24  ;;  %v3391_v48 = vpop.eup %3390  ;;  %v3028_v4 = vmul.f32 -1.442695, %v2023_v42  ;;  %v1108_v50 = vld [vmem:[#allocation4 + $0x38] sm:$0xff] }
 0x210   : > { %v2437_v19 = vmul.f32 %v3456_v16, %v2023_v42  ;;  %v2021_v46 = vadd.f32 %v1989_v3, %v4880_v8  ;;  %2302 = vmatprep.subr.bf16.mxu0 %v4513_v52  ;;  %3193 = vmatprep.subr.bf16.mxu1 %v4513_v52  ;;  %v2232_v60 = vmul.f32 %v3381_v53, %v4355_v20  ;;  %3408 = vrcp.f32 %v2146_v14  ;;  %v3459_v20 = vld [vmem:[%s3710_s15 + $0xe0] sm:$0xff]  ;;  %v3460_v17 = vld [vmem:[%s3710_s15 + $0xf8] sm:$0xff] }
 0x211   : > { %v2144_v24 = vadd.f32 1.0, %v3391_v48  ;;  %v2537_v44 = vadd.f32 %v3457_v2, %v2505_v29  ;;  %v2503_v22 = vmax.f32 %v2471_v5, 0.0  ;;  %v3393_v1 = vpop.eup %3392  ;;  %3410 = vpow2.f32 %v3028_v4 }
 0x212   : > { %v2474_v38 = vadd.f32 %v3458_v28, %v2437_v19  ;;  %v3026_v51 = vmul.f32 -1.442695, %v2021_v46  ;;  %v2435_v6 = vmul.f32 %v3456_v16, %v2021_v46  ;;  %v3395_v52 = vpop.eup %3394  ;;  %v2238_v31 = vmul.f32 %v3393_v1, %v4454_v30 }
 0x213   : > { %3412 = vrcp.f32 %v2144_v24  ;;  %2569 = vst [vmem:[%s3717_s11 + $0xf0] sm:$0xff] %v2537_v44  ;;  %v2535_v53 = vadd.f32 %v3459_v20, %v2503_v22  ;;  %2303 = vmatpush1.bf16.msra.mxu0 %v4537_v62  ;;  %3209 = vmatpush1.bf16.msra.mxu1 %v4537_v62  ;;  %v2233_v54 = vmul.f32 %v3387_v49, %v4375_v45  ;;  %v3397_v56 = vpop.eup %3396  ;;  %v2147_v59 = vadd.f32 1.0, %v3395_v52 }
 0x214   : > { %v2506_v43 = vmax.f32 %v2474_v38, 0.0  ;;  %3414 = vpow2.f32 %v3026_v51  ;;  %v2472_v57 = vadd.f32 %v3458_v28, %v2435_v6  ;;  %2304 = vmatprep.subr.bf16.mxu0 %v4456_v12  ;;  %3194 = vmatprep.subr.bf16.mxu1 %v4456_v12  ;;  %v2236_v62 = vmul.f32 %v3397_v56, %v4424_v34  ;;  %v1102_v34 = vld [vmem:[#allocation4 + $0x68] sm:$0xff] }
 0x215   : > { %v3399_v18 = vpop.eup %3398  ;;  %2567 = vst [vmem:[%s3717_s11 + $0xe0] sm:$0xff] %v2535_v53  ;;  %v4622_v30 = vpack.c.bf16 %v2233_v54, %v2232_v60  ;;  %v4627_v45 = vrot.slane %v4610_v10, %v1123_v63  ;;  %3416 = vrcp.f32 %v2147_v59  ;;  %v3461_v63 = vld [vmem:[%s3710_s15 + $0xe8] sm:$0xff]  ;;  %v3571_v5 = vmov 1.0|1.0  }
 0x216   : > { %v2145_v49 = vadd.f32 1.0, %v3399_v18  ;;  %v2538_v0 = vadd.f32 %v3460_v17, %v2506_v43  ;;  %v2504_v12 = vmax.f32 %v2472_v57, 0.0  ;;  %v3401_v58 = vpop.eup %3400  ;;  %v1103_v18 = vld [vmem:[#allocation4 + $0x10] sm:$0xff] }
 0x217   : > { %2305 = vmatpush1.bf16.msra.mxu0 %v4464_v36  ;;  %3210 = vmatpush1.bf16.msra.mxu1 %v4464_v36  ;;  %vm1130_vm3 = vcmp.eq.s32.totalorder %v1106_v11, %v4627_v45  ;;  %vm1132_vm6 = vcmp.eq.s32.totalorder %v1108_v50, %v4627_v45  ;;  %v4638_v3 = vpack.c.bf16 %v3401_v58, %v3393_v1  ;;  %v1104_v36 = vld [vmem:[#allocation4 + $0x40] sm:$0xff]  ;;  %v1107_v11 = vld [vmem:[#allocation4 + $0x70] sm:$0xff]  ;;  %v1101_v50 = vld [vmem:[#allocation4 + $0x28] sm:$0xff] }
 0x218   : > { %3418 = vrcp.f32 %v2145_v49  ;;  %2570 = vst [vmem:[%s3717_s11 + $0xf8] sm:$0xff] %v2538_v0  ;;  %v2536_v42 = vadd.f32 %v3461_v63, %v2504_v12  ;;  %2306 = vmatprep.subr.bf16.mxu0 %v4466_v39  ;;  %3195 = vmatprep.subr.bf16.mxu1 %v4466_v39  ;;  %v2239_v14 = vmul.f32 %v3401_v58, %v4471_v25  ;;  %vm3033_vm7 = vmpackc.low %vm1132_vm6, %vm1130_vm3  ;;  %v3403_v29 = vpop.eup %3402  ;;  %v1116_v49 = vld [vmem:[#allocation4 + $0x50] sm:$0xff]  ;;  %v2285_v58 = vld [vmem:[#allocation2 + $0x68] sm:$0xff] }
 0x219   : > { %3034 = vmatprep.mubr.msk.bf16.mxu1 %vm3033_vm7, %v3571_v5  ;;  %v3405_v48 = vpop.eup %3404  ;;  %v4645_v16 = vpack.c.bf16 %v3403_v29, %v3397_v56  ;;  %v2237_v19 = vmul.f32 %v3403_v29, %v4437_v33  ;;  %vm1126_vm8 = vcmp.eq.s32.totalorder %v1102_v34, %v4627_v45  ;;  %vm1128_vm9 = vcmp.eq.s32.totalorder %v1104_v36, %v4627_v45  ;;  %v2284_v17 = vld [vmem:[#allocation2 + $0x50] sm:$0xff]  ;;  %v2281_v63 = vld [vmem:[#allocation2] sm:$0xff]  ;;  %v2282_v29 = vld [vmem:[#allocation2 + $0x58] sm:$0xff] }
 0x21a   : > { %2568 = vst [vmem:[%s3717_s11 + $0xe8] sm:$0xff] %v2536_v42  ;;  %v4643_v4 = vpack.c.bf16 %v2239_v14, %v2238_v31  ;;  %v2150_v25 = vadd.f32 1.0, %v3405_v48  ;;  %vm3029_vm10 = vmpackc.low %vm1128_vm9, %vm1126_vm8  ;;  %v1716_v31 = vpop.f32.mrf.mxu1  ;;  %vm1140_vm7 = vcmp.eq.s32.totalorder %v1116_v49, %v4627_v45  ;;  %v2280_v0 = vld [vmem:[#allocation2 + $0x30] sm:$0xff]  ;;  %v2286_v14 = vld [vmem:[#allocation2 + $0x8] sm:$0xff] }
 0x21b   : > { %2307 = vmatpush1.bf16.msra.mxu0 %v4492_v61  ;;  %3211 = vmatpush1.bf16.msra.mxu1 %v4492_v61  ;;  %v4654_v8 = vpack.c.bf16 %v2237_v19, %v2236_v62  ;;  %v1110_v62 = vld [vmem:[#allocation4 + $0x78] sm:$0xff]  ;;  %v2287_v19 = vld [vmem:[#allocation2 + $0x48] sm:$0xff] }
 0x21c   : > { %v3407_v39 = vpop.eup %3406  ;;  %2308 = vmatprep.subr.bf16.mxu0 %v4407_v15  ;;  %3196 = vmatprep.subr.bf16.mxu1 %v4407_v15  ;;  %3420 = vrcp.f32 %v2150_v25  ;;  %vm1134_vm15 = vcmp.eq.s32.totalorder %v1110_v62, %v4627_v45 }
 0x21d   : > { %v2148_v46 = vadd.f32 1.0, %v3407_v39  ;;  %3030 = vmatprep.mubr.msk.bf16.mxu0 %vm3029_vm10, %v3571_v5  ;;  %v3409_v33 = vpop.eup %3408 }
 0x21e   : > { %v3411_v60 = vpop.eup %3410  ;;  %v2242_v1 = vmul.f32 %v3409_v33, %v4518_v47 }
 0x21f   : > { %2309 = vmatpush1.bf16.msra.mxu0 %v4417_v40  ;;  %3212 = vmatpush1.bf16.msra.mxu1 %v4417_v40  ;;  %v2151_v24 = vadd.f32 1.0, %v3411_v60  ;;  %3422 = vrcp.f32 %v2148_v46 }
 0x220   : > { %v3413_v61 = vpop.eup %3412  ;;  %2310 = vmatprep.subr.bf16.mxu0 %v4419_v37  ;;  %3197 = vmatprep.subr.bf16.mxu1 %v4419_v37 }
 0x221   : > { %v3415_v15 = vpop.eup %3414  ;;  %v2240_v2 = vmul.f32 %v3413_v61, %v4483_v23  ;;  %3424 = vrcp.f32 %v2151_v24 }
 0x222   : > { %v2149_v44 = vadd.f32 1.0, %v3415_v15  ;;  %v3417_v22 = vpop.eup %3416 }
 0x223   : > { %2311 = vmatpush1.bf16.msra.mxu0 %v4446_v21  ;;  %3213 = vmatpush1.bf16.msra.mxu1 %v4446_v21  ;;  %v2275_v40 = vpack.c.bf16 %v3417_v22, %v3409_v33  ;;  %v2243_v28 = vmul.f32 %v3417_v22, %v4528_v13  ;;  %v2288_v33 = vld [vmem:[#allocation2 + $0x40] sm:$0xff] }
 0x224   : > { %3426 = vrcp.f32 %v2149_v44 }
 0x225   : > { %v3419_v38 = vpop.eup %3418  ;;  %v2274_v51 = vpack.c.bf16 %v2243_v28, %v2242_v1 }
 0x226   : > { %v2273_v37 = vpack.c.bf16 %v3419_v38, %v3413_v61  ;;  %v2241_v6 = vmul.f32 %v3419_v38, %v4501_v26  ;;  %v2291_v38 = vld [vmem:[#allocation2 + $0x38] sm:$0xff] }
 0x228   : > { %v2272_v52 = vpack.c.bf16 %v2241_v6, %v2240_v2  ;;  %v2289_v2 = vld [vmem:[#allocation2 + $0x20] sm:$0xff] }
 0x229   : > { %v3421_v23 = vpop.eup %3420  ;;  %v2292_v6 = vld [vmem:[#allocation2 + $0x60] sm:$0xff] }
 0x22a   : > { %v2246_v54 = vmul.f32 %v3421_v23, %v4569_v41  ;;  %v1105_v41 = vld [vmem:[#allocation4 + $0x48] sm:$0xff] }
 0x22c   : > { %v3423_v20 = vpop.eup %3422 }
 0x22d   : > { %v2244_v43 = vmul.f32 %v3423_v20, %v4546_v32  ;;  %v1119_v32 = vsub.s32 0, %v4395_v9  ;;  %v1112_v9 = vld [vmem:[#allocation4 + $0x58] sm:$0xff] }
 0x22e   : > { %v3425_v53 = vpop.eup %3424  ;;  %vm1136_vm0 = vcmp.eq.s32.totalorder %v1112_v9, %v4627_v45 }
 0x22f   : > { %v2247_v56 = vmul.f32 %v3425_v53, %v1716_v31  ;;  %v2279_v21 = vpack.c.bf16 %v3425_v53, %v3421_v23  ;;  %vm3037_vm4 = vmpackc.low %vm1136_vm0, %vm1134_vm15 }
 0x231   : > { %v3427_v59 = vpop.eup %3426  ;;  %v2278_v47 = vpack.c.bf16 %v2247_v56, %v2246_v54  ;;  %2312 = vmatprep.subr.bf16.mxu0 %v2279_v21  ;;  %3198 = vmatprep.subr.bf16.mxu1 %v2279_v21  ;;  %v2294_v54 = vld [vmem:[#allocation2 + $0x78] sm:$0xff] }
 0x232   : > { %v2277_v13 = vpack.c.bf16 %v3427_v59, %v3423_v20  ;;  %v2245_v57 = vmul.f32 %v3427_v59, %v4560_v55  ;;  %v1120_v55 = vrot.slane %v4610_v10, %v1119_v32  ;;  %v1114_v10 = vld [vmem:[#allocation4 + $0x8] sm:$0xff]  ;;  %v2293_v20 = vld [vmem:[#allocation2 + $0x70] sm:$0xff] }
 0x233   : > { %2313 = vmatpush2.bf16.msra.mxu0 %v2278_v47  ;;  %3214 = vmatpush2.bf16.msra.mxu1 %v2278_v47  ;;  %vm1138_vm6 = vcmp.eq.s32.totalorder %v1114_v10, %v4627_v45  ;;  %v2295_v59 = vld [vmem:[#allocation2 + $0x28] sm:$0xff] }
 0x234   : > { %v2276_v26 = vpack.c.bf16 %v2245_v57, %v2244_v43  ;;  %2314 = vmatprep.subr.bf16.mxu0 %v2277_v13  ;;  %3199 = vmatprep.subr.bf16.mxu1 %v2277_v13  ;;  %vm1129_vm11 = vcmp.eq.s32.totalorder %v1105_v41, %v1120_v55  ;;  %vm1131_vm12 = vcmp.eq.s32.totalorder %v1107_v11, %v1120_v55  ;;  %vm3041_vm9 = vmpackc.low %vm1140_vm7, %vm1138_vm6 }
 0x235   : > { %vm1125_vm13 = vcmp.eq.s32.totalorder %v1101_v50, %v1120_v55  ;;  %vm1127_vm14 = vcmp.eq.s32.totalorder %v1103_v18, %v1120_v55  ;;  %vm3035_vm1 = vmpackc.low %vm1131_vm12, %vm1129_vm11 }
 0x236   : > { %vm3031_vm2 = vmpackc.low %vm1127_vm14, %vm1125_vm13 }
 0x237   : > { %2315 = vmatpush2.bf16.msra.mxu0 %v2276_v26  ;;  %3215 = vmatpush2.bf16.msra.mxu1 %v2276_v26 }
 0x238   : > { %2316 = vmatprep.subr.bf16.mxu0 %v2275_v40  ;;  %3200 = vmatprep.subr.bf16.mxu1 %v2275_v40  ;;  %v2290_v40 = vld [vmem:[#allocation2 + $0x10] sm:$0xff] }
 0x23b   : > { %2317 = vmatpush2.bf16.msra.mxu0 %v2274_v51  ;;  %3216 = vmatpush2.bf16.msra.mxu1 %v2274_v51 }
 0x23c   : > { %2318 = vmatprep.subr.bf16.mxu0 %v2273_v37  ;;  %3201 = vmatprep.subr.bf16.mxu1 %v2273_v37 }
 0x23f   : > { %2319 = vmatpush2.bf16.msra.mxu0 %v2272_v52  ;;  %3217 = vmatpush2.bf16.msra.mxu1 %v2272_v52 }
 0x240   : > { %2320 = vmatprep.subr.bf16.mxu0 %v4638_v3  ;;  %3202 = vmatprep.subr.bf16.mxu1 %v4638_v3 }
 0x243   : > { %2321 = vmatpush2.bf16.msra.mxu0 %v4643_v4  ;;  %3218 = vmatpush2.bf16.msra.mxu1 %v4643_v4 }
 0x244   : > { %2322 = vmatprep.subr.bf16.mxu0 %v4645_v16  ;;  %3203 = vmatprep.subr.bf16.mxu1 %v4645_v16 }
 0x247   : > { %2323 = vmatpush2.bf16.msra.mxu0 %v4654_v8  ;;  %3219 = vmatpush2.bf16.msra.mxu1 %v4654_v8 }
 0x248   : > { %2324 = vmatprep.subr.bf16.mxu0 %v4583_v27  ;;  %3204 = vmatprep.subr.bf16.mxu1 %v4583_v27  ;;  %v1109_v27 = vld [vmem:[#allocation4 + $0x20] sm:$0xff] }
 0x249   : > { %vm1133_vm5 = vcmp.eq.s32.totalorder %v1109_v27, %v1120_v55 }
 0x24b   : > { %2325 = vmatpush2.bf16.msra.mxu0 %v4591_v7  ;;  %3220 = vmatpush2.bf16.msra.mxu1 %v4591_v7  ;;  %v1111_v7 = vld [vmem:[#allocation4 + $0x18] sm:$0xff] }
 0x24c   : > { %2326 = vmatprep.subr.bf16.mxu0 %v4593_v35  ;;  %3205 = vmatprep.subr.bf16.mxu1 %v4593_v35  ;;  %vm1135_vm3 = vcmp.eq.s32.totalorder %v1111_v7, %v1120_v55  ;;  %v1113_v35 = vld [vmem:[#allocation4] sm:$0xff] }
 0x24d   : > { %vm3039_vm8 = vmpackc.low %vm1135_vm3, %vm1133_vm5  ;;  %vm1137_vm10 = vcmp.eq.s32.totalorder %v1113_v35, %v1120_v55 }
 0x24f   : > { %2327 = vmatpush2.bf16.msra.mxu0 %v4622_v30  ;;  %3221 = vmatpush2.bf16.msra.mxu1 %v4622_v30  ;;  %v1115_v30 = vld [vmem:[#allocation4 + $0x60] sm:$0xff] }
 0x250   : > { %vm1139_vm11 = vcmp.eq.s32.totalorder %v1115_v30, %v1120_v55 }
 0x251   : > { %vm3043_vm12 = vmpackc.low %vm1139_vm11, %vm1137_vm10 }
 0x252   : > { %3036 = vmatmul.mubr.msk.bf16.vlgmr.msra.gmra.mxu1 %vm3035_vm1, %v3571_v5  ;;  %3032 = vmatmul.mubr.msk.bf16.vlgmr.msra.gmra.mxu0 %vm3031_vm2, %v3571_v5 }
 0x253   : > { %3038 = vmatprep.mubr.msk.bf16.mxu1 %vm3037_vm4, %v3571_v5 }
 0x25a   : > { %3040 = vmatmul.mubr.msk.bf16.gmra.mxu1 %vm3039_vm8, %v3571_v5 }
 0x25b   : > { %3042 = vmatprep.mubr.msk.bf16.mxu1 %vm3041_vm9, %v3571_v5 }
 0x262   : > { %3044 = vmatmul.mubr.msk.bf16.gmra.mxu1 %vm3043_vm12, %v3571_v5  ;;  %v2283_v5 = vld [vmem:[#allocation2 + $0x18] sm:$0xff] }
 0x312   : > { %v2340_v12 = vpop.f32.mrf.mxu1  ;;  %v2330_v34 = vpop.f32.mrf.mxu0 }
 0x313   : > { %v2373_v45 = vadd.f32 %v2340_v12, %v2284_v17  ;;  %v2369_v42 = vadd.f32 %v2330_v34, %v2280_v0 }
 0x314   : > { %v2342_v3 = vpop.f32.mrf.mxu1  ;;  %v2332_v36 = vpop.f32.mrf.mxu0 }
 0x315   : > { %2389 = vst [vmem:[#allocation2 + $0x50] sm:$0xff] %v2373_v45  ;;  %v2374_v48 = vadd.f32 %v2342_v3, %v2285_v58  ;;  %2385 = vst [vmem:[#allocation2 + $0x30] sm:$0xff] %v2369_v42  ;;  %v2370_v4 = vadd.f32 %v2332_v36, %v2281_v63 }
 0x316   : > { %v2344_v16 = vpop.f32.mrf.mxu1  ;;  %v2334_v39 = vpop.f32.mrf.mxu0 }
 0x317   : > { %2390 = vst [vmem:[#allocation2 + $0x68] sm:$0xff] %v2374_v48  ;;  %v2375_v25 = vadd.f32 %v2344_v16, %v2286_v14  ;;  %2386 = vst [vmem:[#allocation2] sm:$0xff] %v2370_v4  ;;  %v2371_v8 = vadd.f32 %v2334_v39, %v2282_v29 }
 0x318   : > { %v2346_v46 = vpop.f32.mrf.mxu1  ;;  %v2336_v60 = vpop.f32.mrf.mxu0 }
 0x319   : > { %2391 = vst [vmem:[#allocation2 + $0x8] sm:$0xff] %v2375_v25  ;;  %v2376_v61 = vadd.f32 %v2346_v46, %v2287_v19  ;;  %2387 = vst [vmem:[#allocation2 + $0x58] sm:$0xff] %v2371_v8  ;;  %v2372_v24 = vadd.f32 %v2336_v60, %v2283_v5 }
 0x31a   : > { %v2350_v15 = vpop.f32.mrf.mxu1 }
 0x31b   : > { %2392 = vst [vmem:[#allocation2 + $0x48] sm:$0xff] %v2376_v61  ;;  %v2377_v44 = vadd.f32 %v2350_v15, %v2288_v33  ;;  %2388 = vst [vmem:[#allocation2 + $0x18] sm:$0xff] %v2372_v24 }
 0x31c   : > { %v2352_v22 = vpop.f32.mrf.mxu1 }
 0x31d   : > { %2393 = vst [vmem:[#allocation2 + $0x40] sm:$0xff] %v2377_v44  ;;  %v2378_v1 = vadd.f32 %v2352_v22, %v2289_v2 }
 0x31e   : > { %v2354_v28 = vpop.f32.mrf.mxu1 }
 0x31f   : > { %2394 = vst [vmem:[#allocation2 + $0x20] sm:$0xff] %v2378_v1  ;;  %v2379_v51 = vadd.f32 %v2354_v28, %v2290_v40 }
 0x320   : > { %v2356_v37 = vpop.f32.mrf.mxu1 }
 0x321   : > { %2395 = vst [vmem:[#allocation2 + $0x10] sm:$0xff] %v2379_v51  ;;  %v2380_v52 = vadd.f32 %v2356_v37, %v2291_v38 }
 0x322   : > { %v2360_v23 = vpop.f32.mrf.mxu1 }
 0x323   : > { %2396 = vst [vmem:[#allocation2 + $0x38] sm:$0xff] %v2380_v52  ;;  %v2381_v53 = vadd.f32 %v2360_v23, %v2292_v6 }
 0x324   : > { %v2362_v31 = vpop.f32.mrf.mxu1 }
 0x325   : > { %2397 = vst [vmem:[#allocation2 + $0x60] sm:$0xff] %v2381_v53  ;;  %v2382_v56 = vadd.f32 %v2362_v31, %v2293_v20 }
 0x326   : > { %v2364_v21 = vpop.f32.mrf.mxu1 }
 0x327   : > { %2398 = vst [vmem:[#allocation2 + $0x70] sm:$0xff] %v2382_v56  ;;  %v2383_v43 = vadd.f32 %v2364_v21, %v2294_v54  ;;  %2574 = sbr.rel (%p3047_p13) target bundleno = 855 (0x357), region = 72 }
 0x328   : > { %v2366_v47 = vpop.f32.mrf.mxu1 }
 0x329   : > { %2399 = vst [vmem:[#allocation2 + $0x78] sm:$0xff] %v2383_v43  ;;  %v2384_v13 = vadd.f32 %v2366_v47, %v2295_v59 }
 0x32b   : > { %2400 = vst [vmem:[#allocation2 + $0x28] sm:$0xff] %v2384_v13 }
 0x32c   : > { %v2583_v57 = vld [vmem:[#allocation2] sm:$0xff]  ;;  %v2584_v32 = vld [vmem:[#allocation2 + $0x18] sm:$0xff]  ;;  %v2585_v41 = vld [vmem:[#allocation2 + $0x68] sm:$0xff] }
 0x32d   : > { %v2591_v26 = vadd.f32 1e-06, %v2583_v57  ;;  %v2592_v55 = vadd.f32 1e-06, %v2584_v32  ;;  %v2593_v11 = vadd.f32 1e-06, %v2585_v41 }
 0x32e   : > { %v2586_v50 = vld [vmem:[#allocation2 + $0x48] sm:$0xff]  ;;  %v2587_v62 = vld [vmem:[#allocation2 + $0x20] sm:$0xff]  ;;  %v2588_v27 = vld [vmem:[#allocation2 + $0x38] sm:$0xff] }
 0x32f   : > { %3462 = vrcp.f32 %v2591_v26  ;;  %v2594_v18 = vadd.f32 1e-06, %v2586_v50  ;;  %v2595_v9 = vadd.f32 1e-06, %v2587_v62  ;;  %v2596_v7 = vadd.f32 1e-06, %v2588_v27 }
 0x330   : > { %3464 = vrcp.f32 %v2592_v55  ;;  %v2589_v10 = vld [vmem:[#allocation2 + $0x70] sm:$0xff]  ;;  %v2631_v48 = vld [vmem:[%s4842_s4] sm:$0xff]  ;;  %v2576_v4 = vld [vmem:[#allocation2 + $0x58] sm:$0xff] }
 0x331   : > { %3466 = vrcp.f32 %v2593_v11  ;;  %v2597_v49 = vadd.f32 1e-06, %v2589_v10  ;;  %v2575_v45 = vld [vmem:[#allocation2 + $0x30] sm:$0xff]  ;;  %v4705_v46 = vld [vmem:[%s4847_s9] ss:$0 sm:$0xff]  ;;  %v2632_v33 = vld [vmem:[%s4842_s4 + $0x8] sm:$0xff] }
 0x332   : > { %3468 = vrcp.f32 %v2594_v18  ;;  %v2590_v35 = vld [vmem:[#allocation2 + $0x28] sm:$0xff]  ;;  %v2577_v60 = vld [vmem:[#allocation2 + $0x50] sm:$0xff]  ;;  %v4713_v28 = vld [vmem:[%s4847_s9 + $0x1] ss:$0 sm:$0xff] }
 0x333   : > { %3470 = vrcp.f32 %v2595_v9  ;;  %v2598_v30 = vadd.f32 1e-06, %v2590_v35  ;;  %v2578_v22 = vld [vmem:[#allocation2 + $0x8] sm:$0xff]  ;;  %v2633_v38 = vld [vmem:[%s4842_s4 + $0x10] sm:$0xff]  ;;  %v2579_v37 = vld [vmem:[#allocation2 + $0x40] sm:$0xff] }
 0x334   : > { %3472 = vrcp.f32 %v2596_v7  ;;  %v2634_v31 = vld [vmem:[%s4842_s4 + $0x18] sm:$0xff]  ;;  %v2635_v21 = vld [vmem:[%s4842_s4 + $0x20] sm:$0xff]  ;;  %v2636_v35 = vld [vmem:[%s4842_s4 + $0x28] sm:$0xff] }
 0x335   : > { %3474 = vrcp.f32 %v2597_v49  ;;  %v2581_v41 = vld [vmem:[#allocation2 + $0x60] sm:$0xff] }
 0x336   : > { %3476 = vrcp.f32 %v2598_v30 }
 0x33c   : > { %v3463_v17 = vpop.eup %3462 }
 0x33d   : > { %v2607_v0 = vmul.f32 %v3463_v17, %v2591_v26  ;;  %v3465_v12 = vpop.eup %3464 }
 0x33e   : > { %v2608_v34 = vmul.f32 %v3465_v12, %v2592_v55  ;;  %v3467_v63 = vpop.eup %3466  ;;  %v2580_v55 = vld [vmem:[#allocation2 + $0x10] sm:$0xff] }
 0x33f   : > { %v2615_v58 = vsub.f32 2.0, %v2607_v0  ;;  %v3469_v42 = vpop.eup %3468  ;;  %v2609_v36 = vmul.f32 %v3467_v63, %v2593_v11  ;;  %v2681_v11 = vld [vmem:[%s4841_s3] sm:$0xff]  ;;  %v2682_v0 = vld [vmem:[%s4841_s3 + $0x8] sm:$0xff] }
 0x340   : > { %v2616_v14 = vsub.f32 2.0, %v2608_v34  ;;  %v3471_v29 = vpop.eup %3470  ;;  %v2610_v16 = vmul.f32 %v3469_v42, %v2594_v18 }
 0x341   : > { %v2623_v3 = vmul.f32 %v3463_v17, %v2615_v58  ;;  %v2617_v5 = vsub.f32 2.0, %v2609_v36  ;;  %v2611_v25 = vmul.f32 %v3471_v29, %v2595_v9  ;;  %v3473_v8 = vpop.eup %3472  ;;  %v2582_v17 = vld [vmem:[#allocation2 + $0x78] sm:$0xff] }
 0x342   : > { %v2624_v39 = vmul.f32 %v3465_v12, %v2616_v14  ;;  %v2618_v61 = vsub.f32 2.0, %v2610_v16  ;;  %v3475_v24 = vpop.eup %3474  ;;  %v2612_v6 = vmul.f32 %v3473_v8, %v2596_v7  ;;  %v2638_v36 = vld [vmem:[%s4842_s4 + $0x38] sm:$0xff] }
 0x343   : > { %v2639_v19 = vmul.f32 %v2623_v3, %v2575_v45  ;;  %v2625_v44 = vmul.f32 %v3467_v63, %v2617_v5  ;;  %v2619_v40 = vsub.f32 2.0, %v2611_v25  ;;  %v3477_v1 = vpop.eup %3476  ;;  %v2613_v52 = vmul.f32 %v3475_v24, %v2597_v49  ;;  %v2684_v25 = vld [vmem:[%s4841_s3 + $0x18] sm:$0xff] }
 0x344   : > { %v2640_v2 = vmul.f32 %v2624_v39, %v2576_v4  ;;  %v2626_v51 = vmul.f32 %v3469_v42, %v2618_v61  ;;  %v2620_v59 = vsub.f32 2.0, %v2612_v6  ;;  %v2614_v47 = vmul.f32 %v3477_v1, %v2598_v30  ;;  %v2637_v30 = vld [vmem:[%s4842_s4 + $0x30] sm:$0xff] }
 0x345   : > { %v2647_v15 = vadd.f32 %v2639_v19, %v2631_v48  ;;  %v2641_v53 = vmul.f32 %v2625_v44, %v2577_v60  ;;  %v2627_v54 = vmul.f32 %v3471_v29, %v2619_v40  ;;  %v2621_v43 = vsub.f32 2.0, %v2613_v52  ;;  %v2683_v29 = vld [vmem:[%s4841_s3 + $0x10] sm:$0xff]  ;;  %v2685_v60 = vld [vmem:[%s4841_s3 + $0x20] sm:$0xff] }
 0x346   : > { %v2648_v20 = vadd.f32 %v2640_v2, %v2632_v33  ;;  %v2642_v56 = vmul.f32 %v2626_v51, %v2578_v22  ;;  %v2628_v18 = vmul.f32 %v3473_v8, %v2620_v59  ;;  %v2622_v9 = vsub.f32 2.0, %v2614_v47  ;;  %v2687_v6 = vld [vmem:[%s4841_s3 + $0x30] sm:$0xff] }
 0x347   : > { %v2660_v23 = vmul.f32 %v4705_v46, %v2647_v15  ;;  %v2649_v26 = vadd.f32 %v2641_v53, %v2633_v38  ;;  %v2643_v32 = vmul.f32 %v2627_v54, %v2579_v37  ;;  %v2629_v62 = vmul.f32 %v3475_v24, %v2621_v43  ;;  %v2686_v37 = vld [vmem:[%s4841_s3 + $0x28] sm:$0xff] }
 0x348   : > { %v2661_v57 = vmul.f32 %v4705_v46, %v2648_v20  ;;  %v2650_v50 = vadd.f32 %v2642_v56, %v2634_v31  ;;  %v2644_v58 = vmul.f32 %v2628_v18, %v2580_v55  ;;  %v2630_v63 = vmul.f32 %v3477_v1, %v2622_v9 }
 0x349   : > { %v2673_v13 = vadd.f32 %v4713_v28, %v2660_v23  ;;  %v2662_v10 = vmul.f32 %v4705_v46, %v2649_v26  ;;  %v2651_v49 = vadd.f32 %v2643_v32, %v2635_v21  ;;  %v2645_v34 = vmul.f32 %v2629_v62, %v2581_v41 }
 0x34a   : > { %v2674_v7 = vadd.f32 %v4713_v28, %v2661_v57  ;;  %v2663_v12 = vmul.f32 %v4705_v46, %v2650_v50  ;;  %v2652_v4 = vadd.f32 %v2644_v58, %v2636_v35  ;;  %v2646_v19 = vmul.f32 %v2630_v63, %v2582_v17 }
 0x34b   : > { %v2689_v27 = vmax.f32 %v2673_v13, 0.0  ;;  %v2675_v3 = vadd.f32 %v4713_v28, %v2662_v10  ;;  %v2664_v14 = vmul.f32 %v4705_v46, %v2651_v49  ;;  %v2653_v16 = vadd.f32 %v2645_v34, %v2637_v30 }
 0x34c   : > { %v2690_v42 = vmax.f32 %v2674_v7, 0.0  ;;  %v2676_v48 = vadd.f32 %v4713_v28, %v2663_v12  ;;  %v2665_v61 = vmul.f32 %v4705_v46, %v2652_v4  ;;  %v2654_v15 = vadd.f32 %v2646_v19, %v2638_v36 }
 0x34d   : > { %v2697_v45 = vadd.f32 %v2689_v27, %v2681_v11  ;;  %v2691_v5 = vmax.f32 %v2675_v3, 0.0  ;;  %v2677_v8 = vadd.f32 %v4713_v28, %v2664_v14  ;;  %v2666_v24 = vmul.f32 %v4705_v46, %v2653_v16 }
 0x34e   : > { %v2698_v39 = vadd.f32 %v2690_v42, %v2682_v0  ;;  %v2692_v33 = vmax.f32 %v2676_v48, 0.0  ;;  %v2678_v40 = vadd.f32 %v4713_v28, %v2665_v61  ;;  %v2667_v38 = vmul.f32 %v4705_v46, %v2654_v15  ;;  %v2688_v46 = vld [vmem:[%s4841_s3 + $0x38] sm:$0xff] }
 0x34f   : > { %2705 = vst [vmem:[#allocation5] sm:$0xff] %v2697_v45  ;;  %v2699_v2 = vadd.f32 %v2691_v5, %v2683_v29  ;;  %v2693_v44 = vmax.f32 %v2677_v8, 0.0  ;;  %v2679_v1 = vadd.f32 %v4713_v28, %v2666_v24 }
 0x350   : > { %2706 = vst [vmem:[#allocation5 + $0x8] sm:$0xff] %v2698_v39  ;;  %v2700_v22 = vadd.f32 %v2692_v33, %v2684_v25  ;;  %v2694_v52 = vmax.f32 %v2678_v40, 0.0  ;;  %v2680_v20 = vadd.f32 %v4713_v28, %v2667_v38 }
 0x351   : > { %2707 = vst [vmem:[#allocation5 + $0x10] sm:$0xff] %v2699_v2  ;;  %v2701_v51 = vadd.f32 %v2693_v44, %v2685_v60  ;;  %v2695_v23 = vmax.f32 %v2679_v1, 0.0 }
 0x352   : > { %2708 = vst [vmem:[#allocation5 + $0x18] sm:$0xff] %v2700_v22  ;;  %v2702_v53 = vadd.f32 %v2694_v52, %v2686_v37  ;;  %v2696_v54 = vmax.f32 %v2680_v20, 0.0 }
 0x353   : > { %2709 = vst [vmem:[#allocation5 + $0x20] sm:$0xff] %v2701_v51  ;;  %v2703_v31 = vadd.f32 %v2695_v23, %v2687_v6 }
 0x354   : > { %2710 = vst [vmem:[#allocation5 + $0x28] sm:$0xff] %v2702_v53  ;;  %v2704_v56 = vadd.f32 %v2696_v54, %v2688_v46 }
 0x355   : > { %2711 = vst [vmem:[#allocation5 + $0x30] sm:$0xff] %v2703_v31 }
 0x356   : > { %2712 = vst [vmem:[#allocation5 + $0x38] sm:$0xff] %v2704_v56 }
 0x357 PF: > { %s3572_s24 = smov [#allocation5]  }
 0x358   : > { %s2724_s27 = sshll.u32 %s3572_s24, 4  ;;  %s2725_s27 = int_to_ptr.vmem [resolvable:$true] %s2724_s27 }
 0x359   : > { %s3478_s23 = scalar_lea.vmem %s2725_s27, 1024  ;;  %p3485_p4 = scmp.lt.s32.totalorder %s2725_s27, %s2725_s27 }
 0x35a   : > { %p3479_p0 = scmp.ne.s32.totalorder %s2725_s27, %s3478_s23  ;;  %p3486_p7 = scmp.lt.s32.totalorder %s3478_s23, %s3478_s23 }
 0x35c   : > { %p3480_p1 = pnand %p3479_p0, %p317_p2  ;;  %p3487_p8 = por %p3486_p7, %p3485_p4 }
 0x35e   : > { %p3481_p3 = pneg %p3480_p1 }
 0x360   : > { %p3488_p9 = pnand %p3487_p8, %p3481_p3 }
 0x362   : > { %3491 = shalt.err (!%p3488_p9)
}
 0x363   : > { %s3573_s28 = smov 128   ;;  %s3574_s30 = smov 8  }
 0x364   : > { %s4881_s18 = sld [smem:[#allocation23_spill]]  ;;  %s3057_s19 = sshll.u32 %s3662_s25, 12 }
 0x365   : > { %s2740_s20 = sshll.u32 %s3717_s11, 4  ;;  %s4882_s15 = sld [smem:[#allocation24_spill]]  ;;  %s4790_s20 = int_to_ptr.vmem [resolvable:$true] %s2740_s20 }
 0x366   : > { %s4883_s12 = sand.u32 1, %s3558_s22   ;;  %s3502_s24 = scalar_lea.vmem %s4790_s20, 4096 }
 0x367   : > { %s2714_s21 = scalar_lea.sflag [#allocation8], %s4883_s12  ;;  %p3503_p10 = scmp.ne.s32.totalorder %s4790_s20, %s3502_s24 }
 0x369   : > { %p3504_p11 = pnand %p3503_p10, %p3681_p5 }
 0x36a   : > { %3223 = dma.vmem_to_hbm [thread:$0]  (%p317_p2), %s2725_s27, 1024, %s4881_s18, [#allocation6], %s3573_s28, %s3573_s28, %s3574_s30  }
 0x36b   : > { %s4788_s16 = scalar_lea.hbm %s4882_s15, %s3057_s19  ;;  %p3505_p12 = pneg %p3504_p11 }
 0x36c   : > { %s3575_s27 = smov [#allocation7]  }
 0x36d   : > { %s3506_s23 = sshll.u32 %s3575_s27, 4  ;;  %s3507_s23 = int_to_ptr.vmem [resolvable:$false] %s3506_s23 }
 0x36e   : > { %s3508_s11 = scalar_lea.vmem %s3507_s23, 8192  ;;  %p3509_p13 = scmp.lt.s32.totalorder %s4790_s20, %s3507_s23 }
 0x36f   : > { %p3510_p0 = scmp.lt.s32.totalorder %s3508_s11, %s3502_s24 }
 0x371   : > { %p3511_p1 = por %p3510_p0, %p3509_p13 }
 0x373   : > { %p3512_p3 = pnand %p3511_p1, %p3505_p12 }
 0x375   : > { %3515 = shalt.err (!%p3512_p3)
}
 0x376   : > { %s3516_s14 = scalar_lea.hbm %s4788_s16, 4096  ;;  %s3520_s19 = scalar_lea.hbm %s4882_s15, 8192 }
 0x377   : > { %p3517_p4 = scmp.ne.s32.totalorder %s4788_s16, %s3516_s14  ;;  %p3521_p9 = scmp.lt.s32.totalorder %s4788_s16, %s4882_s15 }
 0x378   : > { %p3522_p10 = scmp.lt.s32.totalorder %s3520_s19, %s3516_s14 }
 0x379   : > { %p3518_p7 = pnand %p3517_p4, %p3681_p5 }
 0x37a   : > { %p3523_p11 = por %p3522_p10, %p3521_p9 }
 0x37b   : > { %p3519_p8 = pneg %p3518_p7 }
 0x37d   : > { %p3524_p12 = pnand %p3523_p11, %p3519_p8 }
 0x37f   : > { %3527 = shalt.err (!%p3524_p12)
}
 0x380   : > { %3224 = dma.vmem_to_hbm [thread:$0]  (%p3681_p5), %s4790_s20, 4096, %s4788_s16, %s2714_s21, %s3573_s28, %s3573_s28, %s3574_s30  }
 0x381   : > { %3545 = dma.done.wait (%p317_p2), [#allocation6], 1024  }
 0x382   : > { %3547 = vsyncadd (%p317_p2), [#allocation6], 4294966272 }
 0x383 PF: > { %s4884_s12 = sld [smem:[#allocation13_spill]] }
 0x384   : > { %s4885_s24 = sld [smem:[#allocation11_spill]] }
 0x389   : > { %p3234_p13 = scmp.ge.s32.totalorder %s4884_s12, 2 }
 0x38a   : > { %s2759_s23 = sand.u32 1, %s4885_s24  }
 0x38b   : > { %p3229_p0 = pnand %p3234_p13, %p3685_p6  ;;  %s2760_s13 = scalar_lea.sflag [#allocation8], %s2759_s23 }
 0x38d   : > { %p3230_p1 = pneg %p3229_p0 }
 0x38f   : > { %3549 = dma.done.wait (%p3230_p1), %s2760_s13, 4096  }
 0x390   : > { %3551 = vsyncadd (%p3230_p1), %s2760_s13, 4294963200  ;;  %s4887_s24 = sld [smem:[#allocation14_spill]]  ;;  %s4890_s21 = smov %s3558_s22 }
 0x391   : > { %s4888_s28 = sld [smem:[#allocation12_spill]] }
 0x392   : > { %s4889_s23 = sld [smem:[#allocation15_spill]] }
 0x396   : > { %p24_p5 = scmp.ge.s32.totalorder %s4887_s24, 4  }
 0x397   : > { %s4891_s22 = smov %s4888_s28 }
 0x398   :  { %26 = sbr.rel (!%p24_p5) target bundleno = 7 (0x7), region = 125 }
 0x39d   :  { %2765 = vsyncpa [#allocation6], 1 }
 0x39e   :  { %2767 = vsyncpa [#allocation6 + $0x1], 1 }
 0x39f   :  { %2768 = vsyncpa [#allocation8], 1 }
 0x3a0   :  { %2770 = vsyncpa [#allocation8 + $0x1], 1 }

</bundles_post_ra>
